<compile_context>
chip_gen: v7x
topology: tpu7x:2x2x1
jax: 0.10.0
libtpu: 0.0.40
codegen_flags: <defaults>
</compile_context>

<pallas_src>
import numpy as np
import jax
import jax.numpy as jnp
from jax import lax
from jax.experimental import pallas as pl
from jax.experimental.pallas import tpu as pltpu


def _round_up(a, m):
    return (a + m - 1) // m * m


def _make_voxelize_kernel(pc_range, voxel_size, padded_dims, c, c_pad,
                          n_tile, v_tile, n_chunks):
    xmin, ymin, zmin, xmax, ymax, zmax = [float(v) for v in pc_range]
    vx, vy, vz = [float(v) for v in voxel_size]
    nzp, nyp, nxp = padded_dims
    lane_pad = _round_up(max(c_pad, 128), 128) - c_pad

    def kernel(cmin_ref, cmax_ref, pts_ref, out_ref, acc_ref):
        b = pl.program_id(0)
        v = pl.program_id(1)
        v_lo = v * v_tile

        acc_ref[...] = jnp.zeros_like(acc_ref)

        # loop-invariant sublane iota of local voxel ids for this tile
        vox_col = lax.broadcasted_iota(jnp.int32, (v_tile, 1), 0)        # [v_tile, 1]

        def chunk_body(ci, carry):
            # scalar skip test: does this N-chunk touch this voxel-id tile at all?
            cmin = cmin_ref[b, ci]
            cmax = cmax_ref[b, ci]
            hit = jnp.logical_and(cmax >= v_lo, cmin < v_lo + v_tile)

            @pl.when(hit)
            def _accumulate():
                off = ci * n_tile
                if not isinstance(off, int):
                    off = pl.multiple_of(off, 128)
                pts = pts_ref[0, :, pl.ds(off, n_tile)]                  # [c_pad, n_tile] f32
                x = pts[0:1, :]
                y = pts[1:2, :]
                z = pts[2:3, :]
                # range filter (inclusive on both ends, like the torch reference)
                keep = ((x >= xmin) & (x <= xmax) &
                        (y >= ymin) & (y <= ymax) &
                        (z >= zmin) & (z <= zmax))                       # [1, n_tile]
                # float->int cast truncates toward zero; kept coords are >= 0 (matches torch)
                cz = ((z - zmin) / vz).astype(jnp.int32)
                cy = ((y - ymin) / vy).astype(jnp.int32)
                cx = ((x - xmin) / vx).astype(jnp.int32)
                lin = cz * (nyp * nxp) + cy * nxp + cx                   # [1, n_tile] z-major id
                lin = jnp.where(keep, lin, -1)
                rel = lin - v_lo                                         # [1, n_tile]

                # transposed one-hot: voxel ids on sublanes, points stay on the lane axis
                one_hot_t = (vox_col == rel).astype(jnp.bfloat16)        # [v_tile, n_tile]

                # bf16 hi/lo split of the tiny points chunk (~f32 accuracy, 2 bf16 MXU passes)
                pts_hi = pts.astype(jnp.bfloat16)
                pts_lo = (pts - pts_hi.astype(jnp.float32)).astype(jnp.bfloat16)

                nt = (((1,), (1,)), ((), ()))                            # contract last dims (A @ B^T)
                part = lax.dot_general(one_hot_t, pts_hi, nt,
                                       preferred_element_type=jnp.float32)
                part = part + lax.dot_general(one_hot_t, pts_lo, nt,
                                              preferred_element_type=jnp.float32)
                acc_ref[...] = acc_ref[...] + part                       # [v_tile, c_pad]

            return carry

        if n_chunks == 1:
            chunk_body(0, 0)
        else:
            lax.fori_loop(0, n_chunks, chunk_body, 0, unroll=n_chunks <= 8)

        # ---- finalize: means = sums * (1/count); write lane-dense [c_pad, v_tile] ----
        acc = acc_ref[...]                                               # [v_tile, c_pad]
        counts = acc[:, c:c + 1]                                         # [v_tile, 1]
        inv = 1.0 / jnp.maximum(counts, 1.0)                             # empty voxels: acc==0 -> 0
        pieces = [acc[:, :c] * inv, counts]
        if c_pad > c + 1:
            pieces.append(acc[:, c + 1:])                                # zero padding columns
        out_t = jnp.concatenate(pieces, axis=1)                          # [v_tile, c_pad]
        if lane_pad:
            out_t = jnp.concatenate(
                [out_t, jnp.zeros((v_tile, lane_pad), jnp.float32)], axis=1)
        out_ref[0] = jnp.transpose(out_t, (1, 0))[:c_pad, :]             # [c_pad, v_tile]

    return kernel


def dynamic_voxel_encoder(points, pc_range, voxel_size):
    """points: [B, N, C] float32. Returns (voxels, coors, num_voxels, shape_np).

    voxels: [B*Vp, C]  valid voxel means compacted to the front (rows >= num_voxels are zeros)
    coors : [B*Vp, 4]  (batch, z, y, x) int32 (rows >= num_voxels are -1), torch.unique order
    """
    B, N, C = points.shape
    pc_range = np.asarray(pc_range, np.float32)
    voxel_size = np.asarray(voxel_size, np.float32)
    shape_np = np.round((pc_range[3:] - pc_range[:3]) / voxel_size).astype(np.int32)  # [nx, ny, nz]
    nx, ny, nz = int(shape_np[0]), int(shape_np[1]), int(shape_np[2])
    nxp, nyp, nzp = nx + 1, ny + 1, nz + 1
    Vp = nzp * nyp * nxp

    xmin, ymin, zmin, xmax, ymax, zmax = [float(v) for v in pc_range]
    vx, vy, vz = [float(v) for v in voxel_size]

    # ---- tile sizes: lane dims multiples of 128 ----
    V_TILE_MAX = 512   # TODO(synk): per-chip tuning (larger tiles pay off on v5e/v6e 128MiB VMEM)
    N_TILE_MAX = 2048
    c_pad = _round_up(C + 1, 8)

    vp_pad = _round_up(Vp, 128)
    if vp_pad <= V_TILE_MAX:
        v_tile = vp_pad
        if B == 1 and vp_pad >= 256:
            # give the two v7x TensorCores at least two parallel voxel tiles
            v_tile = _round_up(vp_pad // 2, 128)
    else:
        v_tile = V_TILE_MAX
    vp_pad = _round_up(vp_pad, v_tile)

    n_pad = _round_up(N, 128)
    if n_pad <= N_TILE_MAX:
        n_tile = n_pad
    else:
        n_tile = N_TILE_MAX
        n_pad = _round_up(N, n_tile)
    n_chunks = n_pad // n_tile

    # ---- lane-dense point slab [B, C_PAD, n_pad]: rows 0..C-1 features, row C ones, rows > C
    #      zeros; padded point columns get an out-of-range x so the kernel filter drops them ----
    pts_f32 = points.astype(jnp.float32)
    oob = xmax + 1.0
    slab = jnp.zeros((B, c_pad, n_pad), jnp.float32)
    slab = slab.at[:, 0, :].set(oob)
    slab = slab.at[:, :C, :N].set(jnp.transpose(pts_f32, (0, 2, 1)))
    slab = slab.at[:, C, :N].set(1.0)

    # ---- per-(batch, chunk) [min, max] linear voxel id for the scalar-prefetch skip test
    #      (identical f32 formula to the kernel, so the bounds are exact) ----
    x = pts_f32[:, :, 0]
    y = pts_f32[:, :, 1]
    z = pts_f32[:, :, 2]
    keep = ((x >= xmin) & (x <= xmax) & (y >= ymin) & (y <= ymax) &
            (z >= zmin) & (z <= zmax))
    cz = ((z - zmin) / vz).astype(jnp.int32)
    cy = ((y - ymin) / vy).astype(jnp.int32)
    cx = ((x - xmin) / vx).astype(jnp.int32)
    lin = cz * (nyp * nxp) + cy * nxp + cx
    big = jnp.int32(2 ** 30)
    lin_lo = jnp.where(keep, lin, big)
    lin_hi = jnp.where(keep, lin, -1)
    if n_pad > N:
        lin_lo = jnp.pad(lin_lo, ((0, 0), (0, n_pad - N)), constant_values=2 ** 30)
        lin_hi = jnp.pad(lin_hi, ((0, 0), (0, n_pad - N)), constant_values=-1)
    chunk_min = lin_lo.reshape(B, n_chunks, n_tile).min(axis=-1)
    chunk_max = lin_hi.reshape(B, n_chunks, n_tile).max(axis=-1)

    kernel = _make_voxelize_kernel(pc_range, voxel_size, (nzp, nyp, nxp), C, c_pad,
                                   n_tile, v_tile, n_chunks)

    est_vmem = (2 * c_pad * n_pad * 4 + 2 * c_pad * v_tile * 4 +
                v_tile * 128 * 4 + v_tile * n_tile * 8 + (8 << 20))
    vmem_limit = int(min(64 << 20, max(32 << 20, est_vmem)))

    out = pl.pallas_call(
        kernel,
        out_shape=jax.ShapeDtypeStruct((B, c_pad, vp_pad), jnp.float32),
        grid_spec=pltpu.PrefetchScalarGridSpec(
            num_scalar_prefetch=2,
            grid=(B, vp_pad // v_tile),
            in_specs=[pl.BlockSpec((1, c_pad, n_pad), lambda b, v, cmin, cmax: (b, 0, 0))],
            out_specs=pl.BlockSpec((1, c_pad, v_tile), lambda b, v, cmin, cmax: (b, 0, v)),
            scratch_shapes=[pltpu.VMEM((v_tile, c_pad), jnp.float32)]),
        compiler_params=pltpu.CompilerParams(
            dimension_semantics=("parallel", "parallel"),
            vmem_limit_bytes=vmem_limit),
    )(chunk_min, chunk_max, slab)

    # ---- plain-JAX glue: decode (z, y, x) per linear voxel id and compact non-empty voxels ----
    # TODO(synk): for production-scale grids (Vp >> 1e5) keep the dense slab + counts downstream
    # instead of this O(B*Vp) gather, or compact with a cumsum prefix kernel.
    means = jnp.transpose(out[:, :C, :Vp], (0, 2, 1))                 # [B, Vp, C]
    counts = out[:, C, :Vp]                                           # [B, Vp]

    lin_ids = jnp.arange(Vp, dtype=jnp.int32)
    dz = lin_ids // (nyp * nxp)
    rem = lin_ids % (nyp * nxp)
    dy = rem // nxp
    dx = rem % nxp
    coords_zyx = jnp.stack([dz, dy, dx], axis=1)                      # [Vp, 3]

    counts_flat = counts.reshape(B * Vp)
    means_flat = means.reshape(B * Vp, C)
    batch_idx = jnp.repeat(jnp.arange(B, dtype=jnp.int32), Vp)
    coords_all = jnp.concatenate([batch_idx[:, None],
                                  jnp.tile(coords_zyx, (B, 1))], axis=1)  # [B*Vp, 4]

    mask = counts_flat > 0
    num_voxels = jnp.sum(mask.astype(jnp.int32))
    # TODO(synk): the torch module returns only the non-empty voxels (data-dependent shape);
    # here they are compacted to the front of a statically-sized buffer + num_voxels count.
    (order,) = jnp.nonzero(mask, size=B * Vp, fill_value=B * Vp)
    means_padded = jnp.concatenate([means_flat, jnp.zeros((1, C), jnp.float32)], axis=0)
    coords_padded = jnp.concatenate([coords_all,
                                     jnp.full((1, 4), -1, jnp.int32)], axis=0)
    voxels_batch = means_padded[order]
    coors_batch = coords_padded[order]
    return voxels_batch, coors_batch, num_voxels, shape_np


if __name__ == "__main__":
    key = jax.random.PRNGKey(0)
    B, N, C = 2, 256, 4
    pc_range = [0.0, 0.0, 0.0, 8.0, 8.0, 2.0]
    voxel_size = [1.0, 1.0, 1.0]

    kx, ky, kz, ki = jax.random.split(key, 4)
    x = jax.random.uniform(kx, (B, N, 1), minval=-1.0, maxval=9.0)
    y = jax.random.uniform(ky, (B, N, 1), minval=-1.0, maxval=9.0)
    z = jax.random.uniform(kz, (B, N, 1), minval=-0.5, maxval=2.5)
    inten = jax.random.uniform(ki, (B, N, 1), minval=0.0, maxval=1.0)
    points = jnp.concatenate([x, y, z, inten], axis=-1).astype(jnp.float32)

    voxels, coors, num_voxels, shape_np = dynamic_voxel_encoder(points, pc_range, voxel_size)
    jax.block_until_ready((voxels, coors, num_voxels))

    # sanity check vs a numpy reference of the torch semantics (all batches)
    pcr = np.asarray(pc_range, np.float32)
    vs = np.asarray(voxel_size, np.float32)
    got_vox_all = np.asarray(voxels)
    got_coor_all = np.asarray(coors)
    offset = 0
    for b in range(B):
        pts_b = np.asarray(points[b])
        keep = ((pts_b[:, 0] >= pcr[0]) & (pts_b[:, 0] <= pcr[3]) &
                (pts_b[:, 1] >= pcr[1]) & (pts_b[:, 1] <= pcr[4]) &
                (pts_b[:, 2] >= pcr[2]) & (pts_b[:, 2] <= pcr[5]))
        p = pts_b[keep]
        coords = ((p[:, [2, 1, 0]] - pcr[[2, 1, 0]]) / vs[[2, 1, 0]]).astype(np.int64)
        uniq, inv = np.unique(coords, axis=0, return_inverse=True)
        ref_vox = np.zeros((uniq.shape[0], C), np.float64)
        cnt = np.zeros((uniq.shape[0],), np.float64)
        np.add.at(ref_vox, inv, p.astype(np.float64))
        np.add.at(cnt, inv, 1.0)
        ref_vox /= cnt[:, None]
        nb = uniq.shape[0]
        got_vox = got_vox_all[offset:offset + nb]
        got_coor = got_coor_all[offset:offset + nb]
        assert np.all(got_coor[:, 0] == b), "batch index column mismatch"
        assert np.array_equal(got_coor[:, 1:].astype(np.int64), uniq), "voxel coords mismatch"
        np.testing.assert_allclose(got_vox, ref_vox, rtol=5e-4, atol=5e-4)
        offset += nb
    assert offset == int(num_voxels), "num_voxels mismatch"
    # padding rows must be the zero/-1 sentinel, not duplicates of a real voxel
    assert np.all(got_vox_all[int(num_voxels):] == 0.0)
    assert np.all(got_coor_all[int(num_voxels):] == -1)

    print("KERNEL_OK")
</pallas_src>

<mosaic_0001>
module attributes {stable_mosaic.version = 11 : i64} {
  func.func @kernel(%arg0: i32, %arg1: i32, %arg2: memref<2x1xi32, #tpu.memory_space<smem>>, %arg3: memref<2x1xi32, #tpu.memory_space<smem>>, %arg4: memref<1x8x256xf32, #tpu.memory_space<vmem>>, %arg5: memref<1x8x256xf32, #tpu.memory_space<vmem>>, %arg6: memref<256x8xf32, #tpu.memory_space<vmem>>) attributes {dimension_semantics = [#tpu.dimension_semantics<parallel>, #tpu.dimension_semantics<parallel>], iteration_bounds = array<i64: 2, 1>, scalar_prefetch = 2 : i64, scratch_operands = 1 : i64, tpu.core_type = #tpu.core_type<tc>, window_params = [{transform_indices = @transform_0, window_bounds = array<i64: 1, 8, 256>}, {transform_indices = @transform_1, window_bounds = array<i64: 1, 8, 256>}]} {
    %c256_i32 = arith.constant 256 : i32
    %0 = arith.muli %arg1, %c256_i32 : i32
    %cst = arith.constant 0.000000e+00 : f32
    %1 = vector.broadcast %cst : f32 to vector<256x8xf32>
    %c0 = arith.constant 0 : index
    %c0_0 = arith.constant 0 : index
    %2 = vector.load %arg6[%c0, %c0_0] : memref<256x8xf32, #tpu.memory_space<vmem>>, vector<256x8xf32>
    tpu.vector_store %arg6[%c0, %c0_0], %1 {strides = array<i32>} : memref<256x8xf32, #tpu.memory_space<vmem>>, vector<256x8xf32>,
    %3 = tpu.iota {dimensions = array<i32: 0>} : vector<256x1xi32>
    %4 = arith.index_cast %arg0 : i32 to index
    %c0_1 = arith.constant 0 : index
    %5 = memref.load %arg2[%4, %c0_1] : memref<2x1xi32, #tpu.memory_space<smem>>
    %6 = arith.index_cast %arg0 : i32 to index
    %c0_2 = arith.constant 0 : index
    %7 = memref.load %arg3[%6, %c0_2] : memref<2x1xi32, #tpu.memory_space<smem>>
    %8 = arith.cmpi sge, %7, %0 : i32
    %c256_i32_3 = arith.constant 256 : i32
    %9 = arith.addi %0, %c256_i32_3 : i32
    %10 = arith.cmpi slt, %5, %9 : i32
    %11 = arith.andi %8, %10 : i1
    %12 = arith.extui %11 : i1 to i32
    %c0_i32 = arith.constant 0 : i32
    %13 = arith.cmpi ne, %12, %c0_i32 : i32
    scf.if %13 {
      %c0_12 = arith.constant 0 : index
      %c0_13 = arith.constant 0 : index
      %c0_14 = arith.constant 0 : index
      %32 = vector.load %arg4[%c0_12, %c0_13, %c0_14] : memref<1x8x256xf32, #tpu.memory_space<vmem>>, vector<1x8x256xf32>
      %33 = vector.shape_cast %32 : vector<1x8x256xf32> to vector<8x256xf32>
      %34 = vector.extract_strided_slice %33 {offsets = [0, 0], sizes = [1, 256], strides = [1, 1]} : vector<8x256xf32> to vector<1x256xf32>
      %35 = vector.extract_strided_slice %33 {offsets = [1, 0], sizes = [1, 256], strides = [1, 1]} : vector<8x256xf32> to vector<1x256xf32>
      %36 = vector.extract_strided_slice %33 {offsets = [2, 0], sizes = [1, 256], strides = [1, 1]} : vector<8x256xf32> to vector<1x256xf32>
      %cst_15 = arith.constant 0.000000e+00 : f32
      %37 = vector.broadcast %cst_15 : f32 to vector<1x256xf32>
      %38 = arith.cmpf oge, %34, %37 : vector<1x256xf32>
      %cst_16 = arith.constant 8.000000e+00 : f32
      %39 = vector.broadcast %cst_16 : f32 to vector<1x256xf32>
      %40 = arith.cmpf ole, %34, %39 : vector<1x256xf32>
      %41 = arith.andi %38, %40 : vector<1x256xi1>
      %cst_17 = arith.constant 0.000000e+00 : f32
      %42 = vector.broadcast %cst_17 : f32 to vector<1x256xf32>
      %43 = arith.cmpf oge, %35, %42 : vector<1x256xf32>
      %44 = arith.andi %41, %43 : vector<1x256xi1>
      %cst_18 = arith.constant 8.000000e+00 : f32
      %45 = vector.broadcast %cst_18 : f32 to vector<1x256xf32>
      %46 = arith.cmpf ole, %35, %45 : vector<1x256xf32>
      %47 = arith.andi %44, %46 : vector<1x256xi1>
      %cst_19 = arith.constant 0.000000e+00 : f32
      %48 = vector.broadcast %cst_19 : f32 to vector<1x256xf32>
      %49 = arith.cmpf oge, %36, %48 : vector<1x256xf32>
      %50 = arith.andi %47, %49 : vector<1x256xi1>
      %cst_20 = arith.constant 2.000000e+00 : f32
      %51 = vector.broadcast %cst_20 : f32 to vector<1x256xf32>
      %52 = arith.cmpf ole, %36, %51 : vector<1x256xf32>
      %53 = arith.andi %50, %52 : vector<1x256xi1>
      %cst_21 = arith.constant 0.000000e+00 : f32
      %54 = vector.broadcast %cst_21 : f32 to vector<1x256xf32>
      %55 = arith.subf %36, %54 : vector<1x256xf32>
      %cst_22 = arith.constant 1.000000e+00 : f32
      %56 = vector.broadcast %cst_22 : f32 to vector<1x256xf32>
      %57 = arith.divf %55, %56 : vector<1x256xf32>
      %58 = arith.fptosi %57 : vector<1x256xf32> to vector<1x256xi32>
      %cst_23 = arith.constant 0.000000e+00 : f32
      %59 = vector.broadcast %cst_23 : f32 to vector<1x256xf32>
      %60 = arith.subf %35, %59 : vector<1x256xf32>
      %cst_24 = arith.constant 1.000000e+00 : f32
      %61 = vector.broadcast %cst_24 : f32 to vector<1x256xf32>
      %62 = arith.divf %60, %61 : vector<1x256xf32>
      %63 = arith.fptosi %62 : vector<1x256xf32> to vector<1x256xi32>
      %cst_25 = arith.constant 0.000000e+00 : f32
      %64 = vector.broadcast %cst_25 : f32 to vector<1x256xf32>
      %65 = arith.subf %34, %64 : vector<1x256xf32>
      %cst_26 = arith.constant 1.000000e+00 : f32
      %66 = vector.broadcast %cst_26 : f32 to vector<1x256xf32>
      %67 = arith.divf %65, %66 : vector<1x256xf32>
      %68 = arith.fptosi %67 : vector<1x256xf32> to vector<1x256xi32>
      %c81_i32 = arith.constant 81 : i32
      %69 = vector.broadcast %c81_i32 : i32 to vector<1x256xi32>
      %70 = arith.muli %58, %69 : vector<1x256xi32>
      %c9_i32 = arith.constant 9 : i32
      %71 = vector.broadcast %c9_i32 : i32 to vector<1x256xi32>
      %72 = arith.muli %63, %71 : vector<1x256xi32>
      %73 = arith.addi %70, %72 : vector<1x256xi32>
      %74 = arith.addi %73, %68 : vector<1x256xi32>
      %c-1_i32 = arith.constant -1 : i32
      %75 = vector.broadcast %c-1_i32 : i32 to vector<1x256xi32>
      %76 = arith.select %53, %74, %75 : vector<1x256xi1>, vector<1x256xi32>
      %77 = vector.broadcast %0 : i32 to vector<1x256xi32>
      %78 = arith.subi %76, %77 : vector<1x256xi32>
      %79 = vector.broadcast %3 : vector<256x1xi32> to vector<256x256xi32>
      %80 = vector.broadcast %78 : vector<1x256xi32> to vector<256x256xi32>
      %81 = arith.cmpi eq, %79, %80 : vector<256x256xi32>
      %82 = arith.extui %81 : vector<256x256xi1> to vector<256x256xi32>
      %83 = arith.sitofp %82 : vector<256x256xi32> to vector<256x256xf32>
      %84 = arith.truncf %83 : vector<256x256xf32> to vector<256x256xbf16>
      %85 = arith.truncf %33 : vector<8x256xf32> to vector<8x256xbf16>
      %86 = arith.extf %85 : vector<8x256xbf16> to vector<8x256xf32>
      %87 = arith.subf %33, %86 : vector<8x256xf32>
      %88 = arith.truncf %87 : vector<8x256xf32> to vector<8x256xbf16>
      %cst_27 = arith.constant dense<0.000000e+00> : vector<256x8xf32>
      %89 = tpu.matmul %84, %85, %cst_27 {dimension_numbers = #tpu.dot_dimension_numbers<[1], [1], [0], [0], [0, 0, 1, 0], [], []>} : vector<256x256xbf16>, vector<8x256xbf16>, vector<256x8xf32> -> vector<256x8xf32>
      %cst_28 = arith.constant dense<0.000000e+00> : vector<256x8xf32>
      %90 = tpu.matmul %84, %88, %cst_28 {dimension_numbers = #tpu.dot_dimension_numbers<[1], [1], [0], [0], [0, 0, 1, 0], [], []>} : vector<256x256xbf16>, vector<8x256xbf16>, vector<256x8xf32> -> vector<256x8xf32>
      %91 = arith.addf %89, %90 : vector<256x8xf32>
      %c0_29 = arith.constant 0 : index
      %c0_30 = arith.constant 0 : index
      %92 = vector.load %arg6[%c0_29, %c0_30] : memref<256x8xf32, #tpu.memory_space<vmem>>, vector<256x8xf32>
      %93 = arith.addf %92, %91 : vector<256x8xf32>
      %c0_31 = arith.constant 0 : index
      %c0_32 = arith.constant 0 : index
      %94 = vector.load %arg6[%c0_31, %c0_32] : memref<256x8xf32, #tpu.memory_space<vmem>>, vector<256x8xf32>
      tpu.vector_store %arg6[%c0_31, %c0_32], %93 {strides = array<i32>} : memref<256x8xf32, #tpu.memory_space<vmem>>, vector<256x8xf32>,
    } else {
    }
    %c0_4 = arith.constant 0 : index
    %c0_5 = arith.constant 0 : index
    %14 = vector.load %arg6[%c0_4, %c0_5] : memref<256x8xf32, #tpu.memory_space<vmem>>, vector<256x8xf32>
    %15 = vector.extract_strided_slice %14 {offsets = [0, 4], sizes = [256, 1], strides = [1, 1]} : vector<256x8xf32> to vector<256x1xf32>
    %cst_6 = arith.constant 1.000000e+00 : f32
    %16 = vector.broadcast %cst_6 : f32 to vector<256x1xf32>
    %17 = arith.maximumf %15, %16 : vector<256x1xf32>
    %cst_7 = arith.constant 1.000000e+00 : f32
    %18 = vector.broadcast %cst_7 : f32 to vector<256x1xf32>
    %19 = arith.divf %18, %17 : vector<256x1xf32>
    %20 = vector.extract_strided_slice %14 {offsets = [0, 0], sizes = [256, 4], strides = [1, 1]} : vector<256x8xf32> to vector<256x4xf32>
    %21 = vector.broadcast %19 : vector<256x1xf32> to vector<256x4xf32>
    %22 = arith.mulf %20, %21 : vector<256x4xf32>
    %23 = vector.extract_strided_slice %14 {offsets = [0, 5], sizes = [256, 3], strides = [1, 1]} : vector<256x8xf32> to vector<256x3xf32>
    %24 = tpu.concatenate %22, %15, %23 in 1 : vector<256x4xf32>, vector<256x1xf32>, vector<256x3xf32> -> vector<256x8xf32>
    %cst_8 = arith.constant 0.000000e+00 : f32
    %25 = vector.broadcast %cst_8 : f32 to vector<256x120xf32>
    %26 = tpu.concatenate %24, %25 in 1 : vector<256x8xf32>, vector<256x120xf32> -> vector<256x128xf32>
    %27 = tpu.transpose %26, [1, 0] : vector<256x128xf32> -> vector<128x256xf32>
    %28 = vector.extract_strided_slice %27 {offsets = [0, 0], sizes = [8, 256], strides = [1, 1]} : vector<128x256xf32> to vector<8x256xf32>
    %c0_9 = arith.constant 0 : index
    %c0_10 = arith.constant 0 : index
    %c0_11 = arith.constant 0 : index
    %29 = vector.load %arg5[%c0_9, %c0_10, %c0_11] : memref<1x8x256xf32, #tpu.memory_space<vmem>>, vector<1x8x256xf32>
    %30 = vector.shape_cast %29 : vector<1x8x256xf32> to vector<8x256xf32>
    %31 = vector.shape_cast %28 : vector<8x256xf32> to vector<1x8x256xf32>
    tpu.vector_store %arg5[%c0_9, %c0_10, %c0_11], %31 {strides = array<i32>} : memref<1x8x256xf32, #tpu.memory_space<vmem>>, vector<1x8x256xf32>,
    return
  }
  func.func @transform_0(%arg0: i32, %arg1: i32, %arg2: memref<2x1xi32, #tpu.memory_space<smem>>, %arg3: memref<2x1xi32, #tpu.memory_space<smem>>) -> (i32, i32, i32) {
    %c0_i32 = arith.constant 0 : i32
    %c0_i32_0 = arith.constant 0 : i32
    %c0_i32_1 = arith.constant 0 : i32
    return %arg0, %c0_i32, %c0_i32_0 : i32, i32, i32
  }
  func.func @transform_1(%arg0: i32, %arg1: i32, %arg2: memref<2x1xi32, #tpu.memory_space<smem>>, %arg3: memref<2x1xi32, #tpu.memory_space<smem>>) -> (i32, i32, i32) {
    %c0_i32 = arith.constant 0 : i32
    %c0_i32_0 = arith.constant 0 : i32
    return %arg0, %c0_i32, %arg1 : i32, i32, i32
  }
}

</mosaic_0001>

<bundles_post_ra>
// kernel: tpu_custom_call.1
= control target key start
LH: loop header
LB: loop body
LE: loop exit
PB: predicated region body
PF: predicated region fallthrough
CT: control target
= control target key end

     0   :  { %s2948_s0 = inlined_call_operand.vmem [shape: s32[2,1], index: 0, kind: input, shape index: {}]   ;;  %s2949_s2 = inlined_call_operand.hbm [shape: f32[2,8,256], index: 2, kind: input, shape index: {}]   ;;  %s2950_s3 = inlined_call_operand.hbm [shape: f32[2,8,256], index: 3, kind: output, shape index: {}]   ;;  %s2951_s1 = inlined_call_operand.vmem [shape: s32[2,1], index: 1, kind: input, shape index: {}]  }
   0x1   :  { %s8_s14 = sshll.u32 %s2948_s0, 4  ;;  %s12_s17 = sshll.u32 %s2951_s1, 4  ;;  %s9_s14 = int_to_ptr.vmem [resolvable:$true] %s8_s14  ;;  %s13_s17 = int_to_ptr.vmem [resolvable:$true] %s12_s17 }
   0x2   :  { %s1887_s18 = scalar_lea.vmem %s9_s14, 32  ;;  %p1892_p1 = scmp.lt.s32.totalorder %s9_s14, %s9_s14 }
   0x3   :  { %p1888_p0 = scmp.ne.s32.totalorder %s9_s14, %s1887_s18  ;;  %p1893_p2 = scmp.lt.s32.totalorder %s1887_s18, %s1887_s18 }
   0x5   :  { %p1894_p3 = por %p1893_p2, %p1892_p1 }
   0x7   :  { %p1895_p4 = pnand %p1894_p3, %p1888_p0 }
   0x9   :  { %1898 = shalt.err (!%p1895_p4)  }
   0xa   :  { %s2027_s19 = smov [#allocation4]   ;;  %s1899_s20 = scalar_lea.vmem %s13_s17, 32 }
   0xb   :  { %11 = dma.vmem_to_smem %s9_s14, 32, %s2027_s19, [#allocation3] }
   0xc   :  { %p1900_p5 = scmp.ne.s32.totalorder %s13_s17, %s1899_s20  ;;  %p1904_p6 = scmp.lt.s32.totalorder %s13_s17, %s13_s17 }
   0xd   :  { %p1905_p7 = scmp.lt.s32.totalorder %s1899_s20, %s1899_s20 }
   0xf   :  { %p1906_p8 = por %p1905_p7, %p1904_p6 }
  0x11   :  { %p1907_p9 = pnand %p1906_p8, %p1900_p5 }
  0x13   :  { %1910 = shalt.err (!%p1907_p9)  }
  0x14   :  { %s2028_s0 = smov [#allocation5]  }
  0x15   :  { %15 = dma.vmem_to_smem %s13_s17, 32, %s2028_s0, [#allocation3] }
  0x16   :  { %1993 = dma.done.wait [#allocation3], 64 }
  0x17   :  { %1994 = vsyncadd [#allocation3], 4294967232 }
  0x18   :  { %17 = sfence }
  0x19   :  { %18 = vsyncpa [#allocation7], 0 }
  0x1a   :  { %20 = vsyncpa [#allocation7 + $0x1], 0 }
  0x1b   :  { %21 = vsyncpa [#allocation8], 0 }
  0x1c   :  { %23 = vsyncpa [#allocation8 + $0x1], 0  ;;  %s2061_s1 = smov 0   ;;  %s2063_s21 = smov 0  }
  0x1d   :  { %s2065_s22 = smov 0   ;;  %s2067_s23 = smov 0  }
  0x1e   :  { %s2069_s24 = smov 0   ;;  %s2071_s25 = smov 0  }
  0x1f LB: > { %s1539_s26 = sadd.s32 4294967295, %s2025_s25   ;;  %s1540_s27 = sadd.s32 4294967294, %s2025_s25   ;;  %s2025_s25 = sphi %s2071_s25, %s29_s25   ;;  %s2021_s24 = sphi %s2069_s24, %s2979_s24   ;;  %s2017_s23 = sphi %s2067_s23, %s2978_s23   ;;  %s2013_s22 = sphi %s2065_s22, %s2977_s22   ;;  %s2009_s21 = sphi %s2063_s21, %s2976_s21   ;;  %s2005_s1 = sphi %s2061_s1, %s2975_s1  }
  0x20   : > { %s41_s28 = sadd.s32 1, %s2021_s24  ;;  %s48_s29 = sadd.s32 1, %s2013_s22 }
  0x21   : > { %p43_p10 = scmp.ge.s32.totalorder %s41_s28, 2  ;;  %p55_p11 = scmp.ne.s32.totalorder %s2013_s22, %s2009_s21 }
  0x22   : > { %p56_p12 = scmp.eq.s32.totalorder %s2025_s25, 0  ;;  %p61_p13 = scmp.ne.s32.totalorder %s2009_s21, %s2005_s1 }
  0x23   : > { %s2981_s28 = smov (%p43_p10, %s41_s28), 0  ;;  %p62_p1 = scmp.eq.s32.totalorder %s1539_s26, 0 }
  0x24   : > { %p2102_p0 = por %p56_p12, %p55_p11  ;;  %s45_s4 = ssub.s32 %s2021_s24, %s2981_s28 }
  0x25   : > { %p87_p2 = scmp.eq.s32.totalorder %s1539_s26, 1  ;;  %p46_p3 = scmp.eq.s32.totalorder %s45_s4, 0 }
  0x26   : > { %p2108_p4 = por %p62_p1, %p61_p13  ;;  %p93_p6 = scmp.eq.s32.totalorder %s1540_s27, 1 }
  0x27   : > { %p2112_p5 = por %p87_p2, %p55_p11  ;;  %p1765_p9 = scmp.lt.s32.totalorder %s2025_s25, 2 }
  0x28   : > { %s2117_s7 = scalar_select %p46_p3, %s2013_s22, %s48_s29  }
  0x29   : > { %s2955_s6 = scalar_select %p2112_p5, 1, 0 }
  0x2a   : > { %p2119_p7 = por %p93_p6, %p61_p13  ;;  %s113_s9 = sand.u32 1, %s2013_s22  }
  0x2b   : > { %s1543_s10 = sshll.u32 %s113_s9, 4  ;;  %s1747_s11 = sshll.u32 %s2021_s24, 8 }
  0x2c   : > { %s2956_s8 = scalar_select %p2119_p7, 1, 0 }
  0x2d   : > { %s2130_s14 = scalar_lea.hbm %s2949_s2, %s1747_s11  ;;  %s117_s15 = scalar_lea.vmem [#allocation6], %s1543_s10 }
  0x2e   : > { %s125_s16 = sshll.u32 %s117_s15, 4  ;;  %p2136_p10 = pnand %p1765_p9, %p2102_p0  ;;  %s2132_s16 = int_to_ptr.vmem [resolvable:$true] %s125_s16 }
  0x2f   : > { %s114_s18 = scalar_lea.sflag [#allocation7], %s113_s9  ;;  %s1911_s19 = scalar_lea.hbm %s2130_s14, 256 }
  0x30   : > { %p1912_p13 = scmp.ne.s32.totalorder %s2130_s14, %s1911_s19  ;;  %p1913_p1 = pneg %p2136_p10 }
  0x31   : > { %s1916_s26 = scalar_lea.hbm %s2949_s2, 512  ;;  %p1917_p0 = scmp.lt.u32.totalorder %s2130_s14, %s2949_s2 }
  0x32   : > { %p1914_p2 = pnand %p1913_p1, %p1912_p13  ;;  %p1918_p6 = scmp.lt.u32.totalorder %s1916_s26, %s1911_s19 }
  0x33   : > { %p1920_p8 = scmp.lt.u32.totalorder %s1911_s19, %s2130_s14 }
  0x34   : > { %p1915_p3 = pneg %p1914_p2  ;;  %p1919_p9 = por %p1918_p6, %p1917_p0 }
  0x36   : > { %p1921_p11 = por %p1920_p8, %p1919_p9 }
  0x38   : > { %p1922_p12 = pnand %p1921_p11, %p1915_p3 }
  0x3a   : > { %1925 = shalt.err (!%p1922_p12)
}
  0x3b   : > { %s1926_s30 = scalar_lea.vmem %s2132_s16, 256  ;;  %s2029_s4 = smov [#allocation6]  }
  0x3c   : > { %p1927_p13 = scmp.ne.s32.totalorder %s2132_s16, %s1926_s30  ;;  %s1931_s9 = sshll.u32 %s2029_s4, 4  ;;  %s1932_s9 = int_to_ptr.vmem [resolvable:$false] %s1931_s9 }
  0x3d   : > { %s1933_s10 = scalar_lea.vmem %s1932_s9, 512  ;;  %p1934_p5 = scmp.lt.s32.totalorder %s2132_s16, %s1932_s9 }
  0x3e   : > { %p1929_p2 = pnand %p1927_p13, %p1913_p1  ;;  %p1935_p0 = scmp.lt.s32.totalorder %s1933_s10, %s1926_s30 }
  0x40   : > { %p1930_p7 = pneg %p1929_p2  ;;  %p1936_p6 = por %p1935_p0, %p1934_p5 }
  0x42   : > { %p1937_p8 = pnand %p1936_p6, %p1930_p7 }
  0x44   : > { %1940 = shalt.err (!%p1937_p8)
}
  0x45   : > { %1760 = dma.hbm_to_vmem [thread:$0]  (!%p2136_p10), %s2130_s14, 256, %s2132_s16, %s114_s18  }
  0x46   : > { %p2958_p11 = scmp.lt.s32.totalorder %s2025_s25, 3  ;;  %p2959_p12 = scmp.ge.s32.totalorder %s2025_s25, 1 }
  0x48   : > { %p131_p1 = pnand %p2959_p12, %p2958_p11 }
  0x49   : > { %s2172_s11 = sand.u32 (!%p131_p1), 1, %s2009_s21  }
  0x4a   : > { %134 = sbr.rel (%p131_p1) target bundleno = 782 (0x30e), region = 24  ;;  %s1547_s12 = sshll.u32 (!%p131_p1), %s2172_s11, 4 }
  0x4b   : > { %s137_s13 = scalar_lea.sflag (!%p131_p1), [#allocation7], %s2172_s11  ;;  %s2178_s15 = scalar_lea.vmem (!%p131_p1), [#allocation6], %s1547_s12 }
  0x51   : > { %1996 = dma.done.wait (%p2108_p4), %s137_s13, 256  }
  0x52   : > { %1998 = vsyncadd (%p2108_p4), %s137_s13, 4294967040  ;;  %s1549_s14 = sshll.u32 %s2017_s23, 7  ;;  %vm162_vm0 = vcmask 64512   ;;  %v195_v0 = vlaneseq  ;;  %v2030_v1 = vmov 0.0   ;;  %s2320_s5 = scalar_lea.vmem [#allocation9], %s1547_s12 }
  0x53   : > { %s2185_s16 = sld [smem:[#allocation4 + %s1549_s14]]  ;;  %163 = vst.msk [vmem:[#allocation2] sm:$0xff] %vm162_vm0, %v2030_v1  ;;  %164 = vst.msk [vmem:[#allocation2 + $0x8] sm:$0xff] %vm162_vm0, %v2030_v1 }
  0x54   : > { %s2187_s17 = sld [smem:[#allocation5 + %s1549_s14]]  ;;  %165 = vst.msk [vmem:[#allocation2 + $0x10] sm:$0xff] %vm162_vm0, %v2030_v1  ;;  %166 = vst.msk [vmem:[#allocation2 + $0x18] sm:$0xff] %vm162_vm0, %v2030_v1  ;;  %v2221_v2 = vshrl.u32 %v195_v0, 7 }
  0x55   : > { %167 = vst.msk [vmem:[#allocation2 + $0x20] sm:$0xff] %vm162_vm0, %v2030_v1  ;;  %168 = vst.msk [vmem:[#allocation2 + $0x28] sm:$0xff] %vm162_vm0, %v2030_v1 }
  0x56   : > { %169 = vst.msk [vmem:[#allocation2 + $0x30] sm:$0xff] %vm162_vm0, %v2030_v1  ;;  %170 = vst.msk [vmem:[#allocation2 + $0x38] sm:$0xff] %vm162_vm0, %v2030_v1  ;;  %v2224_v3 = vadd.s32 8, %v2221_v2  ;;  %v2227_v4 = vadd.s32 16, %v2221_v2  ;;  %v2230_v5 = vadd.s32 24, %v2221_v2  ;;  %v2233_v6 = vadd.s32 32, %v2221_v2 }
  0x57   : > { %171 = vst.msk [vmem:[#allocation2 + $0x40] sm:$0xff] %vm162_vm0, %v2030_v1  ;;  %172 = vst.msk [vmem:[#allocation2 + $0x48] sm:$0xff] %vm162_vm0, %v2030_v1  ;;  %v2236_v7 = vadd.s32 40, %v2221_v2  ;;  %v2239_v8 = vadd.s32 48, %v2221_v2  ;;  %v2242_v9 = vadd.s32 56, %v2221_v2  ;;  %v2245_v10 = vadd.s32 64, %v2221_v2 }
  0x58   : > { %173 = vst.msk [vmem:[#allocation2 + $0x50] sm:$0xff] %vm162_vm0, %v2030_v1  ;;  %174 = vst.msk [vmem:[#allocation2 + $0x58] sm:$0xff] %vm162_vm0, %v2030_v1  ;;  %v2248_v11 = vadd.s32 72, %v2221_v2  ;;  %v2251_v12 = vadd.s32 80, %v2221_v2  ;;  %v2254_v13 = vadd.s32 88, %v2221_v2  ;;  %v2257_v14 = vadd.s32 96, %v2221_v2 }
  0x59   : > { %175 = vst.msk [vmem:[#allocation2 + $0x60] sm:$0xff] %vm162_vm0, %v2030_v1  ;;  %176 = vst.msk [vmem:[#allocation2 + $0x68] sm:$0xff] %vm162_vm0, %v2030_v1  ;;  %p233_p5 = scmp.lt.s32.totalorder %s2185_s16, 256  ;;  %v2262_v15 = vadd.s32 104, %v2221_v2  ;;  %v2265_v16 = vadd.s32 112, %v2221_v2  ;;  %v2268_v17 = vadd.s32 120, %v2221_v2 }
  0x5a   : > { %177 = vst.msk [vmem:[#allocation2 + $0x70] sm:$0xff] %vm162_vm0, %v2030_v1  ;;  %178 = vst.msk [vmem:[#allocation2 + $0x78] sm:$0xff] %vm162_vm0, %v2030_v1  ;;  %p231_p4 = scmp.ge.s32.totalorder %s2187_s17, 0  ;;  %v2271_v18 = vadd.s32 128, %v2221_v2  ;;  %v2274_v19 = vadd.s32 136, %v2221_v2  ;;  %v2277_v20 = vadd.s32 144, %v2221_v2 }
  0x5b   : > { %179 = vst.msk [vmem:[#allocation2 + $0x80] sm:$0xff] %vm162_vm0, %v2030_v1  ;;  %180 = vst.msk [vmem:[#allocation2 + $0x88] sm:$0xff] %vm162_vm0, %v2030_v1  ;;  %v2280_v21 = vadd.s32 152, %v2221_v2  ;;  %v2283_v22 = vadd.s32 160, %v2221_v2  ;;  %v2286_v23 = vadd.s32 168, %v2221_v2  ;;  %v2289_v24 = vadd.s32 176, %v2221_v2 }
  0x5c   : > { %181 = vst.msk [vmem:[#allocation2 + $0x90] sm:$0xff] %vm162_vm0, %v2030_v1  ;;  %182 = vst.msk [vmem:[#allocation2 + $0x98] sm:$0xff] %vm162_vm0, %v2030_v1  ;;  %p234_p7 = pnand %p233_p5, %p231_p4  ;;  %v2292_v25 = vadd.s32 184, %v2221_v2  ;;  %v2295_v26 = vadd.s32 192, %v2221_v2  ;;  %v2298_v27 = vadd.s32 200, %v2221_v2  ;;  %v2301_v28 = vadd.s32 208, %v2221_v2 }
  0x5d   : > { %183 = vst.msk [vmem:[#allocation2 + $0xa0] sm:$0xff] %vm162_vm0, %v2030_v1  ;;  %184 = vst.msk [vmem:[#allocation2 + $0xa8] sm:$0xff] %vm162_vm0, %v2030_v1  ;;  %v2304_v29 = vadd.s32 216, %v2221_v2  ;;  %v2307_v30 = vadd.s32 224, %v2221_v2  ;;  %v2310_v31 = vadd.s32 232, %v2221_v2  ;;  %v2313_v32 = vadd.s32 240, %v2221_v2 }
  0x5e   : > { %185 = vst.msk [vmem:[#allocation2 + $0xb0] sm:$0xff] %vm162_vm0, %v2030_v1  ;;  %186 = vst.msk [vmem:[#allocation2 + $0xb8] sm:$0xff] %vm162_vm0, %v2030_v1  ;;  %v2316_v33 = vadd.s32 248, %v2221_v2  ;;  %237 = sbr.rel (%p234_p7) target bundleno = 459 (0x1cb), region = 32  ;;  %v239_v34 = vld [vmem:[%s2178_s15 + $0x8] sm:$0xff] (!%p234_p7)  ;;  %v2031_v36 = vmov (!%p234_p7), 0  }
  0x5f   : > { %187 = vst.msk [vmem:[#allocation2 + $0xc0] sm:$0xff] %vm162_vm0, %v2030_v1  ;;  %188 = vst.msk [vmem:[#allocation2 + $0xc8] sm:$0xff] %vm162_vm0, %v2030_v1  ;;  %vm241_vm1 = vcmp.ge.f32.partialorder (!%p234_p7), %v239_v34, 0.0  ;;  %vm243_vm2 = vcmp.le.f32.partialorder (!%p234_p7), %v239_v34, 8.0  ;;  %vm269_vm3 = vcmp.le.f32.partialorder (!%p234_p7), %v239_v34, 2.0  ;;  %v1751_v35 = vtrunc.f32 (!%p234_p7), %v239_v34  ;;  %v238_v45 = vld [vmem:[%s2178_s15] sm:$0xff] (!%p234_p7) }
  0x60   : > { %189 = vst.msk [vmem:[#allocation2 + $0xd0] sm:$0xff] %vm162_vm0, %v2030_v1  ;;  %190 = vst.msk [vmem:[#allocation2 + $0xd8] sm:$0xff] %vm162_vm0, %v2030_v1  ;;  %v247_v37 = vsel (!%p234_p7), %vm241_vm1, 1, %v2031_v36  ;;  %v255_v38 = vsel (!%p234_p7), %vm243_vm2, 1, %v2031_v36  ;;  %v271_v39 = vsel (!%p234_p7), %vm269_vm3, 1, %v2031_v36  ;;  %v532_v40 = vpack.c.bf16 (!%p234_p7), %v239_v34, %v239_v34 }
  0x61   : > { %191 = vst.msk [vmem:[#allocation2 + $0xe0] sm:$0xff] %vm162_vm0, %v2030_v1  ;;  %192 = vst.msk [vmem:[#allocation2 + $0xe8] sm:$0xff] %vm162_vm0, %v2030_v1  ;;  %v249_v42 = vrot.slane (!%p234_p7), %v247_v37, 1  ;;  %v257_v43 = vrot.slane (!%p234_p7), %v255_v38, 1  ;;  %v263_v44 = vrot.slane (!%p234_p7), %v247_v37, 2  ;;  %v1752_v46 = vcvt.f32.s32 (!%p234_p7), %v1751_v35 }
  0x62   : > { %193 = vst.msk [vmem:[#allocation2 + $0xf0] sm:$0xff] %vm162_vm0, %v2030_v1  ;;  %194 = vst.msk [vmem:[#allocation2 + $0xf8] sm:$0xff] %vm162_vm0, %v2030_v1  ;;  %v534_v47 = vunpack.c.l.bf16 (!%p234_p7), %v532_v40  ;;  %700 = vmatprep.subr.bf16.mxu1 (!%p234_p7), %v532_v40  ;;  %vm240_vm5 = vcmp.ge.f32.partialorder (!%p234_p7), %v238_v45, 0.0  ;;  %vm242_vm6 = vcmp.le.f32.partialorder (!%p234_p7), %v238_v45, 8.0  ;;  %v273_v49 = vrot.slane (!%p234_p7), %v271_v39, 2 }
  0x63   : > { %vm2323_vm4 = vmand (!%p234_p7), %vm241_vm1, %vm243_vm2  ;;  %vm251_vm7 = vcmp.ne.s32.totalorder (!%p234_p7), %v249_v42, 0  ;;  %vm259_vm8 = vcmp.ne.s32.totalorder (!%p234_p7), %v257_v43, 0  ;;  %vm2328_vm9 = vcmp.ne.s32.totalorder (!%p234_p7), %v263_v44, 0  ;;  %v281_v50 = vmul.u32 (!%p234_p7), 81, %v1752_v46 }
  0x64   : > { %vm253_vm10 = vmand (!%p234_p7), %vm2323_vm4, %vm251_vm7  ;;  %v283_v51 = vmul.u32 (!%p234_p7), 9, %v1752_v46  ;;  %v289_v52 = vrot.slane (!%p234_p7), %v1752_v46, 6  ;;  %v536_v53 = vsub.f32 (!%p234_p7), %v239_v34, %v534_v47  ;;  %v246_v55 = vsel (!%p234_p7), %vm240_vm5, 1, %v2031_v36 }
  0x65   : > { %vm2334_vm11 = vmand %vm253_vm10, %vm259_vm8  ;;  %v254_v56 = vsel %vm242_vm6, 1, %v2031_v36  ;;  %vm268_vm12 = vcmp.le.f32.partialorder %v238_v45, 2.0  ;;  %v1749_v57 = vtrunc.f32 %v238_v45  ;;  %v248_v61 = vrot.slane %v246_v55, 1 }
  0x66   : > { %v285_v58 = vrot.slane %v283_v51, 7  ;;  %v538_v59 = vpack.c.bf16 %v536_v53, %v536_v53  ;;  %vm2342_vm13 = vmand %vm240_vm5, %vm242_vm6  ;;  %v256_v62 = vrot.slane %v254_v56, 1  ;;  %v262_v63 = vrot.slane %v246_v55, 2 }
  0x67   : > { %v270_v0 = vsel %vm268_vm12, 1, %v2031_v36  ;;  %v1750_v1 = vcvt.f32.s32 %v1749_v57  ;;  %v531_v34 = vpack.c.bf16 %v238_v45, %v238_v45  ;;  %vm267_vm14 = vmand %vm2334_vm11, %vm2328_vm9  ;;  %vm275_vm15 = vcmp.ne.s32.totalorder %v273_v49, 0 }
  0x68   : > { %v287_v35 = vadd.s32 %v285_v58, %v281_v50  ;;  %539 = vmatprep.subr.bf16.mxu0 %v538_v59  ;;  %vm250_vm1 = vcmp.ne.s32.totalorder %v248_v61, 0  ;;  %vm258_vm2 = vcmp.ne.s32.totalorder %v256_v62, 0  ;;  %v272_v37 = vrot.slane %v270_v0, 2  ;;  %vm277_vm6 = vmand %vm267_vm14, %vm275_vm15  ;;  %v866_v61 = vld [vmem:[#allocation2 + $0x28] sm:$0xff] }
  0x69   : > { %vm252_vm3 = vmand %vm2342_vm13, %vm250_vm1  ;;  %v280_v38 = vmul.u32 81, %v1750_v1  ;;  %v282_v39 = vmul.u32 9, %v1750_v1  ;;  %701 = vmatpush1.bf16.xpose.msra.mxu1 %v531_v34  ;;  %vm2356_vm5 = vcmp.ne.s32.totalorder %v262_v63, 0  ;;  %v533_v42 = vunpack.c.l.bf16 %v531_v34 }
  0x6a   : > { %v291_v36 = vadd.s32 %v289_v52, %v287_v35  ;;  %vm2352_vm4 = vmand %vm252_vm3, %vm258_vm2  ;;  %v301_v43 = vsub.s32 0, %v2221_v2  ;;  %v288_v46 = vrot.slane %v1750_v1, 6  ;;  %vm274_vm8 = vcmp.ne.s32.totalorder %v272_v37, 0 }
  0x6b   : > { %v284_v44 = vrot.slane %v282_v39, 7  ;;  %v535_v49 = vsub.f32 %v238_v45, %v533_v42  ;;  %vm266_vm7 = vmand %vm2352_vm4, %vm2356_vm5  ;;  %v2032_v55 = vmov 1.0|1.0  }
  0x6c   : > { %v293_v47 = vrot.slane %v291_v36, 2  ;;  %vm276_vm9 = vmand %vm266_vm7, %vm274_vm8 }
  0x6d   : > { %v286_v50 = vadd.s32 %v284_v44, %v280_v38  ;;  %v537_v52 = vpack.c.bf16 %v535_v49, %v535_v49  ;;  %v867_v38 = vld [vmem:[#allocation2 + $0x30] sm:$0xff] }
  0x6e   : > { %v295_v51 = vsel %vm277_vm6, %v293_v47, 4294967295 }
  0x6f   : > { %v2370_v53 = vrot.slane %v295_v51, %v301_v43  ;;  %v290_v48 = vadd.s32 %v288_v46, %v286_v50  ;;  %540 = vmatpush1.bf16.xpose.msra.mxu0 %v537_v52 }
  0x71   : > { %v292_v54 = vrot.slane %v290_v48, 2  ;;  %vm308_vm10 = vcmp.eq.s32.totalorder %v2221_v2, %v2370_v53  ;;  %vm310_vm11 = vcmp.eq.s32.totalorder %v2224_v3, %v2370_v53  ;;  %vm312_vm13 = vcmp.eq.s32.totalorder %v2227_v4, %v2370_v53 }
  0x72   : > { %vm1614_vm12 = vmpackc.low %vm310_vm11, %vm308_vm10  ;;  %vm314_vm14 = vcmp.eq.s32.totalorder %v2230_v5, %v2370_v53  ;;  %vm316_vm6 = vcmp.eq.s32.totalorder %v2233_v6, %v2370_v53  ;;  %vm318_vm7 = vcmp.eq.s32.totalorder %v2236_v7, %v2370_v53 }
  0x73   : > { %v294_v45 = vsel %vm276_vm9, %v292_v54, 4294967295  ;;  %1615 = vmatprep.mubr.msk.bf16.mxu0 %vm1614_vm12, %v2032_v55  ;;  %1679 = vmatprep.mubr.msk.bf16.mxu1 %vm1614_vm12, %v2032_v55  ;;  %vm1618_vm2 = vmpackc.low %vm314_vm14, %vm312_vm13  ;;  %vm320_vm12 = vcmp.eq.s32.totalorder %v2239_v8, %v2370_v53  ;;  %vm322_vm13 = vcmp.eq.s32.totalorder %v2242_v9, %v2370_v53 }
  0x74   : > { %v2382_v56 = vrot.slane %v294_v45, %v301_v43  ;;  %vm1622_vm9 = vmpackc.low %vm318_vm7, %vm316_vm6  ;;  %v868_v43 = vld [vmem:[#allocation2 + $0x38] sm:$0xff] }
  0x76   : > { %vm307_vm15 = vcmp.eq.s32.totalorder %v2221_v2, %v2382_v56  ;;  %vm309_vm1 = vcmp.eq.s32.totalorder %v2224_v3, %v2382_v56  ;;  %vm311_vm4 = vcmp.eq.s32.totalorder %v2227_v4, %v2382_v56  ;;  %vm313_vm5 = vcmp.eq.s32.totalorder %v2230_v5, %v2382_v56  ;;  %v861_v4 = vld [vmem:[#allocation2] sm:$0xff] }
  0x77   : > { %vm1616_vm3 = vmpackc.low %vm309_vm1, %vm307_vm15  ;;  %vm315_vm10 = vcmp.eq.s32.totalorder %v2233_v6, %v2382_v56  ;;  %vm317_vm11 = vcmp.eq.s32.totalorder %v2236_v7, %v2382_v56  ;;  %vm319_vm1 = vcmp.eq.s32.totalorder %v2239_v8, %v2382_v56  ;;  %vm323_vm7 = vcmp.eq.s32.totalorder %v2245_v10, %v2382_v56 }
  0x78   : > { %1617 = vmatmul.mubr.msk.bf16.vlgmr.msra.gmra.mrb[0].mxu0 %vm1616_vm3, %v2032_v55  ;;  %1681 = vmatmul.mubr.msk.bf16.vlgmr.msra.gmra.mrb[0].mxu1 %vm1616_vm3, %v2032_v55  ;;  %vm1620_vm8 = vmpackc.low %vm313_vm5, %vm311_vm4  ;;  %vm324_vm3 = vcmp.eq.s32.totalorder %v2245_v10, %v2370_v53  ;;  %vm326_vm4 = vcmp.eq.s32.totalorder %v2248_v11, %v2370_v53  ;;  %v862_v10 = vld [vmem:[#allocation2 + $0x8] sm:$0xff] }
  0x79   : > { %1619 = vmatprep.mubr.msk.bf16.mxu0 %vm1618_vm2, %v2032_v55  ;;  %1683 = vmatprep.mubr.msk.bf16.mxu1 %vm1618_vm2, %v2032_v55  ;;  %vm1624_vm14 = vmpackc.low %vm317_vm11, %vm315_vm10  ;;  %vm321_vm2 = vcmp.eq.s32.totalorder %v2242_v9, %v2382_v56  ;;  %vm330_vm10 = vcmp.eq.s32.totalorder %v2254_v13, %v2370_v53 }
  0x7a   : > { %vm1626_vm15 = vmpackc.low %vm322_vm13, %vm320_vm12  ;;  %vm327_vm13 = vcmp.eq.s32.totalorder %v2251_v12, %v2382_v56 }
  0x7b   : > { %vm1628_vm5 = vmpackc.low %vm321_vm2, %vm319_vm1  ;;  %vm334_vm1 = vcmp.eq.s32.totalorder %v2262_v15, %v2370_v53 }
  0x7c   : > { %vm1630_vm6 = vmpackc.low %vm326_vm4, %vm324_vm3  ;;  %vm331_vm4 = vcmp.eq.s32.totalorder %v2257_v14, %v2382_v56 }
  0x80   : > { %1621 = vmatmul.mubr.msk.bf16.gmra.mrb[4].mxu0 %vm1620_vm8, %v2032_v55  ;;  %1685 = vmatmul.mubr.msk.bf16.gmra.mrb[4].mxu1 %vm1620_vm8, %v2032_v55  ;;  %vm325_vm8 = vcmp.eq.s32.totalorder %v2248_v11, %v2382_v56 }
  0x81   : > { %1623 = vmatprep.mubr.msk.bf16.mxu0 %vm1622_vm9, %v2032_v55  ;;  %1687 = vmatprep.mubr.msk.bf16.mxu1 %vm1622_vm9, %v2032_v55  ;;  %vm328_vm9 = vcmp.eq.s32.totalorder %v2251_v12, %v2370_v53  ;;  %vm1632_vm11 = vmpackc.low %vm325_vm8, %vm323_vm7  ;;  %vm338_vm7 = vcmp.eq.s32.totalorder %v2268_v17, %v2370_v53 }
  0x82   : > { %vm1634_vm12 = vmpackc.low %vm330_vm10, %vm328_vm9  ;;  %vm335_vm10 = vcmp.eq.s32.totalorder %v2265_v16, %v2382_v56 }
  0x88   : > { %1625 = vmatmul.mubr.msk.bf16.gmra.mrb[8].mxu0 %vm1624_vm14, %v2032_v55  ;;  %1689 = vmatmul.mubr.msk.bf16.gmra.mrb[8].mxu1 %vm1624_vm14, %v2032_v55  ;;  %vm329_vm14 = vcmp.eq.s32.totalorder %v2254_v13, %v2382_v56 }
  0x89   : > { %1627 = vmatprep.mubr.msk.bf16.mxu0 %vm1626_vm15, %v2032_v55  ;;  %1691 = vmatprep.mubr.msk.bf16.mxu1 %vm1626_vm15, %v2032_v55  ;;  %vm332_vm15 = vcmp.eq.s32.totalorder %v2257_v14, %v2370_v53  ;;  %vm1636_vm2 = vmpackc.low %vm329_vm14, %vm327_vm13  ;;  %vm342_vm13 = vcmp.eq.s32.totalorder %v2274_v19, %v2370_v53 }
  0x8a   : > { %vm1638_vm3 = vmpackc.low %vm334_vm1, %vm332_vm15  ;;  %vm339_vm1 = vcmp.eq.s32.totalorder %v2271_v18, %v2382_v56 }
  0x90   : > { %1629 = vmatmul.mubr.msk.bf16.gmra.mrb[12].mxu0 %vm1628_vm5, %v2032_v55  ;;  %1693 = vmatmul.mubr.msk.bf16.gmra.mrb[12].mxu1 %vm1628_vm5, %v2032_v55  ;;  %vm333_vm5 = vcmp.eq.s32.totalorder %v2262_v15, %v2382_v56 }
  0x91   : > { %1631 = vmatprep.mubr.msk.bf16.mxu0 %vm1630_vm6, %v2032_v55  ;;  %1695 = vmatprep.mubr.msk.bf16.mxu1 %vm1630_vm6, %v2032_v55  ;;  %vm336_vm6 = vcmp.eq.s32.totalorder %v2265_v16, %v2370_v53  ;;  %vm1640_vm8 = vmpackc.low %vm333_vm5, %vm331_vm4  ;;  %vm346_vm4 = vcmp.eq.s32.totalorder %v2280_v21, %v2370_v53 }
  0x92   : > { %vm1642_vm9 = vmpackc.low %vm338_vm7, %vm336_vm6  ;;  %vm343_vm7 = vcmp.eq.s32.totalorder %v2277_v20, %v2382_v56 }
  0x98   : > { %1633 = vmatmul.mubr.msk.bf16.gmra.mrb[16].mxu0 %vm1632_vm11, %v2032_v55  ;;  %1697 = vmatmul.mubr.msk.bf16.gmra.mrb[16].mxu1 %vm1632_vm11, %v2032_v55  ;;  %vm337_vm11 = vcmp.eq.s32.totalorder %v2268_v17, %v2382_v56 }
  0x99   : > { %1635 = vmatprep.mubr.msk.bf16.mxu0 %vm1634_vm12, %v2032_v55  ;;  %1699 = vmatprep.mubr.msk.bf16.mxu1 %vm1634_vm12, %v2032_v55  ;;  %vm340_vm12 = vcmp.eq.s32.totalorder %v2271_v18, %v2370_v53  ;;  %vm1644_vm14 = vmpackc.low %vm337_vm11, %vm335_vm10  ;;  %vm350_vm10 = vcmp.eq.s32.totalorder %v2286_v23, %v2370_v53  ;;  %v863_v18 = vld [vmem:[#allocation2 + $0x10] sm:$0xff] }
  0x9a   : > { %vm1646_vm15 = vmpackc.low %vm342_vm13, %vm340_vm12  ;;  %vm347_vm13 = vcmp.eq.s32.totalorder %v2283_v22, %v2382_v56 }
  0xa0   : > { %1637 = vmatmul.mubr.msk.bf16.gmra.mrb[20].mxu0 %vm1636_vm2, %v2032_v55  ;;  %1701 = vmatmul.mubr.msk.bf16.gmra.mrb[20].mxu1 %vm1636_vm2, %v2032_v55  ;;  %vm341_vm2 = vcmp.eq.s32.totalorder %v2274_v19, %v2382_v56 }
  0xa1   : > { %1639 = vmatprep.mubr.msk.bf16.mxu0 %vm1638_vm3, %v2032_v55  ;;  %1703 = vmatprep.mubr.msk.bf16.mxu1 %vm1638_vm3, %v2032_v55  ;;  %vm344_vm3 = vcmp.eq.s32.totalorder %v2277_v20, %v2370_v53  ;;  %vm1648_vm5 = vmpackc.low %vm341_vm2, %vm339_vm1  ;;  %vm354_vm1 = vcmp.eq.s32.totalorder %v2292_v25, %v2370_v53 }
  0xa2   : > { %vm1650_vm6 = vmpackc.low %vm346_vm4, %vm344_vm3  ;;  %vm351_vm4 = vcmp.eq.s32.totalorder %v2289_v24, %v2382_v56 }
  0xa8   : > { %1641 = vmatmul.mubr.msk.bf16.gmra.mrb[24].mxu0 %vm1640_vm8, %v2032_v55  ;;  %1705 = vmatmul.mubr.msk.bf16.gmra.mrb[24].mxu1 %vm1640_vm8, %v2032_v55  ;;  %vm345_vm8 = vcmp.eq.s32.totalorder %v2280_v21, %v2382_v56 }
  0xa9   : > { %1643 = vmatprep.mubr.msk.bf16.mxu0 %vm1642_vm9, %v2032_v55  ;;  %1707 = vmatprep.mubr.msk.bf16.mxu1 %vm1642_vm9, %v2032_v55  ;;  %vm348_vm9 = vcmp.eq.s32.totalorder %v2283_v22, %v2370_v53  ;;  %vm1652_vm11 = vmpackc.low %vm345_vm8, %vm343_vm7  ;;  %vm358_vm7 = vcmp.eq.s32.totalorder %v2298_v27, %v2370_v53 }
  0xaa   : > { %vm1654_vm12 = vmpackc.low %vm350_vm10, %vm348_vm9  ;;  %vm355_vm10 = vcmp.eq.s32.totalorder %v2295_v26, %v2382_v56 }
  0xb0   : > { %1645 = vmatmul.mubr.msk.bf16.gmra.mrb[28].mxu0 %vm1644_vm14, %v2032_v55  ;;  %1709 = vmatmul.mubr.msk.bf16.gmra.mrb[28].mxu1 %vm1644_vm14, %v2032_v55  ;;  %vm349_vm14 = vcmp.eq.s32.totalorder %v2286_v23, %v2382_v56 }
  0xb1   : > { %1647 = vmatprep.mubr.msk.bf16.mxu0 %vm1646_vm15, %v2032_v55  ;;  %1711 = vmatprep.mubr.msk.bf16.mxu1 %vm1646_vm15, %v2032_v55  ;;  %vm352_vm15 = vcmp.eq.s32.totalorder %v2289_v24, %v2370_v53  ;;  %vm1656_vm2 = vmpackc.low %vm349_vm14, %vm347_vm13  ;;  %vm362_vm13 = vcmp.eq.s32.totalorder %v2304_v29, %v2370_v53  ;;  %v864_v24 = vld [vmem:[#allocation2 + $0x18] sm:$0xff] }
  0xb2   : > { %vm1658_vm3 = vmpackc.low %vm354_vm1, %vm352_vm15  ;;  %vm359_vm1 = vcmp.eq.s32.totalorder %v2301_v28, %v2382_v56 }
  0xb8   : > { %1649 = vmatmul.mubr.msk.bf16.gmra.mrb[32].mxu0 %vm1648_vm5, %v2032_v55  ;;  %1713 = vmatmul.mubr.msk.bf16.gmra.mrb[32].mxu1 %vm1648_vm5, %v2032_v55  ;;  %vm353_vm5 = vcmp.eq.s32.totalorder %v2292_v25, %v2382_v56 }
  0xb9   : > { %1651 = vmatprep.mubr.msk.bf16.mxu0 %vm1650_vm6, %v2032_v55  ;;  %1715 = vmatprep.mubr.msk.bf16.mxu1 %vm1650_vm6, %v2032_v55  ;;  %vm356_vm6 = vcmp.eq.s32.totalorder %v2295_v26, %v2370_v53  ;;  %vm1660_vm8 = vmpackc.low %vm353_vm5, %vm351_vm4  ;;  %vm366_vm4 = vcmp.eq.s32.totalorder %v2310_v31, %v2370_v53 }
  0xba   : > { %vm1662_vm9 = vmpackc.low %vm358_vm7, %vm356_vm6  ;;  %vm363_vm7 = vcmp.eq.s32.totalorder %v2307_v30, %v2382_v56 }
  0xc0   : > { %1653 = vmatmul.mubr.msk.bf16.gmra.mrb[36].mxu0 %vm1652_vm11, %v2032_v55  ;;  %1717 = vmatmul.mubr.msk.bf16.gmra.mrb[36].mxu1 %vm1652_vm11, %v2032_v55  ;;  %vm357_vm11 = vcmp.eq.s32.totalorder %v2298_v27, %v2382_v56 }
  0xc1   : > { %1655 = vmatprep.mubr.msk.bf16.mxu0 %vm1654_vm12, %v2032_v55  ;;  %1719 = vmatprep.mubr.msk.bf16.mxu1 %vm1654_vm12, %v2032_v55  ;;  %vm360_vm12 = vcmp.eq.s32.totalorder %v2301_v28, %v2370_v53  ;;  %vm1664_vm14 = vmpackc.low %vm357_vm11, %vm355_vm10  ;;  %vm370_vm10 = vcmp.eq.s32.totalorder %v2316_v33, %v2370_v53 }
  0xc2   : > { %vm1666_vm15 = vmpackc.low %vm362_vm13, %vm360_vm12  ;;  %vm367_vm13 = vcmp.eq.s32.totalorder %v2313_v32, %v2382_v56 }
  0xc8   : > { %1657 = vmatmul.mubr.msk.bf16.gmra.mrb[40].mxu0 %vm1656_vm2, %v2032_v55  ;;  %1721 = vmatmul.mubr.msk.bf16.gmra.mrb[40].mxu1 %vm1656_vm2, %v2032_v55  ;;  %vm361_vm2 = vcmp.eq.s32.totalorder %v2304_v29, %v2382_v56 }
  0xc9   : > { %1659 = vmatprep.mubr.msk.bf16.mxu0 %vm1658_vm3, %v2032_v55  ;;  %1723 = vmatprep.mubr.msk.bf16.mxu1 %vm1658_vm3, %v2032_v55  ;;  %vm364_vm3 = vcmp.eq.s32.totalorder %v2307_v30, %v2370_v53  ;;  %vm1668_vm5 = vmpackc.low %vm361_vm2, %vm359_vm1 }
  0xca   : > { %vm1670_vm6 = vmpackc.low %vm366_vm4, %vm364_vm3 }
  0xd0   : > { %1661 = vmatmul.mubr.msk.bf16.gmra.mrb[44].mxu0 %vm1660_vm8, %v2032_v55  ;;  %1725 = vmatmul.mubr.msk.bf16.gmra.mrb[44].mxu1 %vm1660_vm8, %v2032_v55  ;;  %vm365_vm8 = vcmp.eq.s32.totalorder %v2310_v31, %v2382_v56 }
  0xd1   : > { %1663 = vmatprep.mubr.msk.bf16.mxu0 %vm1662_vm9, %v2032_v55  ;;  %1727 = vmatprep.mubr.msk.bf16.mxu1 %vm1662_vm9, %v2032_v55  ;;  %vm368_vm9 = vcmp.eq.s32.totalorder %v2313_v32, %v2370_v53  ;;  %vm1672_vm11 = vmpackc.low %vm365_vm8, %vm363_vm7  ;;  %v865_v32 = vld [vmem:[#allocation2 + $0x20] sm:$0xff] }
  0xd2   : > { %vm1674_vm12 = vmpackc.low %vm370_vm10, %vm368_vm9  ;;  %v869_v53 = vld [vmem:[#allocation2 + $0x40] sm:$0xff] }
  0xd8   : > { %1665 = vmatmul.mubr.msk.bf16.gmra.mrb[48].mxu0 %vm1664_vm14, %v2032_v55  ;;  %1729 = vmatmul.mubr.msk.bf16.gmra.mrb[48].mxu1 %vm1664_vm14, %v2032_v55  ;;  %vm369_vm14 = vcmp.eq.s32.totalorder %v2316_v33, %v2382_v56 }
  0xd9   : > { %1667 = vmatprep.mubr.msk.bf16.mxu0 %vm1666_vm15, %v2032_v55  ;;  %1731 = vmatprep.mubr.msk.bf16.mxu1 %vm1666_vm15, %v2032_v55  ;;  %vm1676_vm15 = vmpackc.low %vm369_vm14, %vm367_vm13 }
  0xe0   : > { %1669 = vmatmul.mubr.msk.bf16.gmra.mrb[52].mxu0 %vm1668_vm5, %v2032_v55  ;;  %1733 = vmatmul.mubr.msk.bf16.gmra.mrb[52].mxu1 %vm1668_vm5, %v2032_v55 }
  0xe1   : > { %1671 = vmatprep.mubr.msk.bf16.mxu0 %vm1670_vm6, %v2032_v55  ;;  %1735 = vmatprep.mubr.msk.bf16.mxu1 %vm1670_vm6, %v2032_v55 }
  0xe8   : > { %1673 = vmatmul.mubr.msk.bf16.gmra.mrb[56].mxu0 %vm1672_vm11, %v2032_v55  ;;  %1737 = vmatmul.mubr.msk.bf16.gmra.mrb[56].mxu1 %vm1672_vm11, %v2032_v55 }
  0xe9   : > { %1675 = vmatprep.mubr.msk.bf16.mxu0 %vm1674_vm12, %v2032_v55  ;;  %1739 = vmatprep.mubr.msk.bf16.mxu1 %vm1674_vm12, %v2032_v55 }
  0xf0   : > { %1677 = vmatmul.mubr.msk.bf16.gmra.mrb[60].mxu0 %vm1676_vm15, %v2032_v55  ;;  %1741 = vmatmul.mubr.msk.bf16.gmra.mrb[60].mxu1 %vm1676_vm15, %v2032_v55 }
 0x14b   : > { %v573_v2 = vpop.f32.mrb[0].mxu0  ;;  %v734_v3 = vpop.f32.mrb[0].mxu1 }
 0x14c   : > { %v735_v5 = vadd.f32 %v734_v3, %v573_v2  ;;  %v575_v6 = vpop.f32.mrb[1].mxu0  ;;  %v736_v7 = vpop.f32.mrb[1].mxu1  ;;  %v870_v2 = vld [vmem:[#allocation2 + $0x48] sm:$0xff] }
 0x14d   : > { %v576_v8 = vpop.f32.mrb[2].mxu0  ;;  %v737_v9 = vpop.f32.mrb[2].mxu1 }
 0x14e   : > { %v893_v11 = vadd.f32 %v861_v4, %v735_v5  ;;  %v738_v12 = vadd.f32 %v737_v9, %v576_v8  ;;  %v578_v13 = vpop.f32.mrb[3].mxu0  ;;  %v739_v14 = vpop.f32.mrb[3].mxu1 }
 0x150   : > { %925 = vst.msk [vmem:[#allocation2] sm:$0xff] %vm162_vm0, %v893_v11  ;;  %v894_v15 = vadd.f32 %v862_v10, %v738_v12  ;;  %v871_v10 = vld [vmem:[#allocation2 + $0x50] sm:$0xff] }
 0x152   : > { %926 = vst.msk [vmem:[#allocation2 + $0x8] sm:$0xff] %vm162_vm0, %v894_v15 }
 0x153   : > { %v581_v16 = vpop.f32.mrb[4].mxu0  ;;  %v742_v17 = vpop.f32.mrb[4].mxu1 }
 0x154   : > { %v743_v19 = vadd.f32 %v742_v17, %v581_v16  ;;  %v583_v20 = vpop.f32.mrb[5].mxu0  ;;  %v744_v21 = vpop.f32.mrb[5].mxu1  ;;  %v872_v16 = vld [vmem:[#allocation2 + $0x58] sm:$0xff] }
 0x155   : > { %v584_v22 = vpop.f32.mrb[6].mxu0  ;;  %v745_v23 = vpop.f32.mrb[6].mxu1 }
 0x156   : > { %v895_v25 = vadd.f32 %v863_v18, %v743_v19  ;;  %v746_v26 = vadd.f32 %v745_v23, %v584_v22  ;;  %v586_v27 = vpop.f32.mrb[7].mxu0  ;;  %v747_v28 = vpop.f32.mrb[7].mxu1 }
 0x158   : > { %927 = vst.msk [vmem:[#allocation2 + $0x10] sm:$0xff] %vm162_vm0, %v895_v25  ;;  %v896_v29 = vadd.f32 %v864_v24, %v746_v26  ;;  %v873_v24 = vld [vmem:[#allocation2 + $0x60] sm:$0xff] }
 0x15a   : > { %928 = vst.msk [vmem:[#allocation2 + $0x18] sm:$0xff] %vm162_vm0, %v896_v29 }
 0x15b   : > { %v589_v30 = vpop.f32.mrb[8].mxu0  ;;  %v750_v31 = vpop.f32.mrb[8].mxu1 }
 0x15c   : > { %v751_v33 = vadd.f32 %v750_v31, %v589_v30  ;;  %v591_v57 = vpop.f32.mrb[9].mxu0  ;;  %v752_v58 = vpop.f32.mrb[9].mxu1  ;;  %v874_v30 = vld [vmem:[#allocation2 + $0x68] sm:$0xff] }
 0x15d   : > { %v592_v59 = vpop.f32.mrb[10].mxu0  ;;  %v753_v60 = vpop.f32.mrb[10].mxu1 }
 0x15e   : > { %v897_v62 = vadd.f32 %v865_v32, %v751_v33  ;;  %v754_v63 = vadd.f32 %v753_v60, %v592_v59  ;;  %v594_v0 = vpop.f32.mrb[11].mxu0  ;;  %v755_v1 = vpop.f32.mrb[11].mxu1 }
 0x160   : > { %929 = vst.msk [vmem:[#allocation2 + $0x20] sm:$0xff] %vm162_vm0, %v897_v62  ;;  %v898_v34 = vadd.f32 %v866_v61, %v754_v63  ;;  %v875_v61 = vld [vmem:[#allocation2 + $0x70] sm:$0xff] }
 0x162   : > { %930 = vst.msk [vmem:[#allocation2 + $0x28] sm:$0xff] %vm162_vm0, %v898_v34 }
 0x163   : > { %v597_v35 = vpop.f32.mrb[12].mxu0  ;;  %v758_v37 = vpop.f32.mrb[12].mxu1 }
 0x164   : > { %v759_v39 = vadd.f32 %v758_v37, %v597_v35  ;;  %v599_v36 = vpop.f32.mrb[13].mxu0  ;;  %v760_v40 = vpop.f32.mrb[13].mxu1  ;;  %v876_v35 = vld [vmem:[#allocation2 + $0x78] sm:$0xff] }
 0x165   : > { %v600_v41 = vpop.f32.mrb[14].mxu0  ;;  %v761_v42 = vpop.f32.mrb[14].mxu1 }
 0x166   : > { %v899_v44 = vadd.f32 %v867_v38, %v759_v39  ;;  %v762_v46 = vadd.f32 %v761_v42, %v600_v41  ;;  %v602_v47 = vpop.f32.mrb[15].mxu0  ;;  %v763_v49 = vpop.f32.mrb[15].mxu1 }
 0x168   : > { %931 = vst.msk [vmem:[#allocation2 + $0x30] sm:$0xff] %vm162_vm0, %v899_v44  ;;  %v900_v50 = vadd.f32 %v868_v43, %v762_v46  ;;  %v877_v43 = vld [vmem:[#allocation2 + $0x80] sm:$0xff] }
 0x16a   : > { %932 = vst.msk [vmem:[#allocation2 + $0x38] sm:$0xff] %vm162_vm0, %v900_v50 }
 0x16b   : > { %v605_v51 = vpop.f32.mrb[16].mxu0  ;;  %v766_v52 = vpop.f32.mrb[16].mxu1 }
 0x16c   : > { %v767_v48 = vadd.f32 %v766_v52, %v605_v51  ;;  %v607_v54 = vpop.f32.mrb[17].mxu0  ;;  %v768_v45 = vpop.f32.mrb[17].mxu1  ;;  %v878_v51 = vld [vmem:[#allocation2 + $0x88] sm:$0xff] }
 0x16d   : > { %v608_v55 = vpop.f32.mrb[18].mxu0  ;;  %v769_v56 = vpop.f32.mrb[18].mxu1 }
 0x16e   : > { %v901_v3 = vadd.f32 %v869_v53, %v767_v48  ;;  %v770_v4 = vadd.f32 %v769_v56, %v608_v55  ;;  %v610_v5 = vpop.f32.mrb[19].mxu0  ;;  %v771_v6 = vpop.f32.mrb[19].mxu1 }
 0x170   : > { %933 = vst.msk [vmem:[#allocation2 + $0x40] sm:$0xff] %vm162_vm0, %v901_v3  ;;  %v902_v7 = vadd.f32 %v870_v2, %v770_v4  ;;  %v879_v2 = vld [vmem:[#allocation2 + $0x90] sm:$0xff] }
 0x172   : > { %934 = vst.msk [vmem:[#allocation2 + $0x48] sm:$0xff] %vm162_vm0, %v902_v7 }
 0x173   : > { %v613_v8 = vpop.f32.mrb[20].mxu0  ;;  %v774_v9 = vpop.f32.mrb[20].mxu1 }
 0x174   : > { %v775_v11 = vadd.f32 %v774_v9, %v613_v8  ;;  %v615_v12 = vpop.f32.mrb[21].mxu0  ;;  %v776_v13 = vpop.f32.mrb[21].mxu1  ;;  %v880_v8 = vld [vmem:[#allocation2 + $0x98] sm:$0xff] }
 0x175   : > { %v616_v14 = vpop.f32.mrb[22].mxu0  ;;  %v777_v15 = vpop.f32.mrb[22].mxu1 }
 0x176   : > { %v903_v17 = vadd.f32 %v871_v10, %v775_v11  ;;  %v778_v18 = vadd.f32 %v777_v15, %v616_v14  ;;  %v618_v19 = vpop.f32.mrb[23].mxu0  ;;  %v779_v20 = vpop.f32.mrb[23].mxu1 }
 0x178   : > { %935 = vst.msk [vmem:[#allocation2 + $0x50] sm:$0xff] %vm162_vm0, %v903_v17  ;;  %v904_v21 = vadd.f32 %v872_v16, %v778_v18  ;;  %v881_v16 = vld [vmem:[#allocation2 + $0xa0] sm:$0xff] }
 0x17a   : > { %936 = vst.msk [vmem:[#allocation2 + $0x58] sm:$0xff] %vm162_vm0, %v904_v21 }
 0x17b   : > { %v621_v22 = vpop.f32.mrb[24].mxu0  ;;  %v782_v23 = vpop.f32.mrb[24].mxu1 }
 0x17c   : > { %v783_v25 = vadd.f32 %v782_v23, %v621_v22  ;;  %v623_v26 = vpop.f32.mrb[25].mxu0  ;;  %v784_v27 = vpop.f32.mrb[25].mxu1  ;;  %v882_v22 = vld [vmem:[#allocation2 + $0xa8] sm:$0xff] }
 0x17d   : > { %v624_v28 = vpop.f32.mrb[26].mxu0  ;;  %v785_v29 = vpop.f32.mrb[26].mxu1 }
 0x17e   : > { %v905_v31 = vadd.f32 %v873_v24, %v783_v25  ;;  %v786_v32 = vadd.f32 %v785_v29, %v624_v28  ;;  %v626_v33 = vpop.f32.mrb[27].mxu0  ;;  %v787_v57 = vpop.f32.mrb[27].mxu1 }
 0x180   : > { %937 = vst.msk [vmem:[#allocation2 + $0x60] sm:$0xff] %vm162_vm0, %v905_v31  ;;  %v906_v58 = vadd.f32 %v874_v30, %v786_v32  ;;  %v883_v30 = vld [vmem:[#allocation2 + $0xb0] sm:$0xff] }
 0x182   : > { %938 = vst.msk [vmem:[#allocation2 + $0x68] sm:$0xff] %vm162_vm0, %v906_v58 }
 0x183   : > { %v629_v59 = vpop.f32.mrb[28].mxu0  ;;  %v790_v60 = vpop.f32.mrb[28].mxu1 }
 0x184   : > { %v791_v62 = vadd.f32 %v790_v60, %v629_v59  ;;  %v631_v63 = vpop.f32.mrb[29].mxu0  ;;  %v792_v0 = vpop.f32.mrb[29].mxu1  ;;  %v884_v59 = vld [vmem:[#allocation2 + $0xb8] sm:$0xff] }
 0x185   : > { %v632_v1 = vpop.f32.mrb[30].mxu0  ;;  %v793_v34 = vpop.f32.mrb[30].mxu1 }
 0x186   : > { %v907_v37 = vadd.f32 %v875_v61, %v791_v62  ;;  %v794_v38 = vadd.f32 %v793_v34, %v632_v1  ;;  %v634_v39 = vpop.f32.mrb[31].mxu0  ;;  %v795_v36 = vpop.f32.mrb[31].mxu1 }
 0x188   : > { %939 = vst.msk [vmem:[#allocation2 + $0x70] sm:$0xff] %vm162_vm0, %v907_v37  ;;  %v908_v40 = vadd.f32 %v876_v35, %v794_v38  ;;  %v885_v35 = vld [vmem:[#allocation2 + $0xc0] sm:$0xff] }
 0x18a   : > { %940 = vst.msk [vmem:[#allocation2 + $0x78] sm:$0xff] %vm162_vm0, %v908_v40 }
 0x18b   : > { %v637_v41 = vpop.f32.mrb[32].mxu0  ;;  %v798_v42 = vpop.f32.mrb[32].mxu1 }
 0x18c   : > { %v799_v44 = vadd.f32 %v798_v42, %v637_v41  ;;  %v639_v46 = vpop.f32.mrb[33].mxu0  ;;  %v800_v47 = vpop.f32.mrb[33].mxu1  ;;  %v886_v41 = vld [vmem:[#allocation2 + $0xc8] sm:$0xff] }
 0x18d   : > { %v640_v49 = vpop.f32.mrb[34].mxu0  ;;  %v801_v50 = vpop.f32.mrb[34].mxu1 }
 0x18e   : > { %v909_v52 = vadd.f32 %v877_v43, %v799_v44  ;;  %v802_v53 = vadd.f32 %v801_v50, %v640_v49  ;;  %v642_v48 = vpop.f32.mrb[35].mxu0  ;;  %v803_v54 = vpop.f32.mrb[35].mxu1 }
 0x190   : > { %941 = vst.msk [vmem:[#allocation2 + $0x80] sm:$0xff] %vm162_vm0, %v909_v52  ;;  %v910_v45 = vadd.f32 %v878_v51, %v802_v53  ;;  %v887_v51 = vld [vmem:[#allocation2 + $0xd0] sm:$0xff] }
 0x192   : > { %942 = vst.msk [vmem:[#allocation2 + $0x88] sm:$0xff] %vm162_vm0, %v910_v45 }
 0x193   : > { %v645_v55 = vpop.f32.mrb[36].mxu0  ;;  %v806_v56 = vpop.f32.mrb[36].mxu1 }
 0x194   : > { %v807_v3 = vadd.f32 %v806_v56, %v645_v55  ;;  %v647_v4 = vpop.f32.mrb[37].mxu0  ;;  %v808_v5 = vpop.f32.mrb[37].mxu1  ;;  %v888_v55 = vld [vmem:[#allocation2 + $0xd8] sm:$0xff] }
 0x195   : > { %v648_v6 = vpop.f32.mrb[38].mxu0  ;;  %v809_v7 = vpop.f32.mrb[38].mxu1 }
 0x196   : > { %v911_v9 = vadd.f32 %v879_v2, %v807_v3  ;;  %v810_v10 = vadd.f32 %v809_v7, %v648_v6  ;;  %v650_v11 = vpop.f32.mrb[39].mxu0  ;;  %v811_v12 = vpop.f32.mrb[39].mxu1 }
 0x198   : > { %943 = vst.msk [vmem:[#allocation2 + $0x90] sm:$0xff] %vm162_vm0, %v911_v9  ;;  %v912_v13 = vadd.f32 %v880_v8, %v810_v10  ;;  %v889_v8 = vld [vmem:[#allocation2 + $0xe0] sm:$0xff] }
 0x19a   : > { %944 = vst.msk [vmem:[#allocation2 + $0x98] sm:$0xff] %vm162_vm0, %v912_v13 }
 0x19b   : > { %v653_v14 = vpop.f32.mrb[40].mxu0  ;;  %v814_v15 = vpop.f32.mrb[40].mxu1 }
 0x19c   : > { %v815_v17 = vadd.f32 %v814_v15, %v653_v14  ;;  %v655_v18 = vpop.f32.mrb[41].mxu0  ;;  %v816_v19 = vpop.f32.mrb[41].mxu1  ;;  %v890_v14 = vld [vmem:[#allocation2 + $0xe8] sm:$0xff] }
 0x19d   : > { %v656_v20 = vpop.f32.mrb[42].mxu0  ;;  %v817_v21 = vpop.f32.mrb[42].mxu1 }
 0x19e   : > { %v913_v23 = vadd.f32 %v881_v16, %v815_v17  ;;  %v818_v24 = vadd.f32 %v817_v21, %v656_v20  ;;  %v658_v25 = vpop.f32.mrb[43].mxu0  ;;  %v819_v26 = vpop.f32.mrb[43].mxu1 }
 0x1a0   : > { %945 = vst.msk [vmem:[#allocation2 + $0xa0] sm:$0xff] %vm162_vm0, %v913_v23  ;;  %v914_v27 = vadd.f32 %v882_v22, %v818_v24  ;;  %v891_v22 = vld [vmem:[#allocation2 + $0xf0] sm:$0xff] }
 0x1a2   : > { %946 = vst.msk [vmem:[#allocation2 + $0xa8] sm:$0xff] %vm162_vm0, %v914_v27 }
 0x1a3   : > { %v661_v28 = vpop.f32.mrb[44].mxu0  ;;  %v822_v29 = vpop.f32.mrb[44].mxu1 }
 0x1a4   : > { %v823_v31 = vadd.f32 %v822_v29, %v661_v28  ;;  %v663_v32 = vpop.f32.mrb[45].mxu0  ;;  %v824_v33 = vpop.f32.mrb[45].mxu1  ;;  %v892_v28 = vld [vmem:[#allocation2 + $0xf8] sm:$0xff] }
 0x1a5   : > { %v664_v57 = vpop.f32.mrb[46].mxu0  ;;  %v825_v58 = vpop.f32.mrb[46].mxu1 }
 0x1a6   : > { %v915_v60 = vadd.f32 %v883_v30, %v823_v31  ;;  %v826_v61 = vadd.f32 %v825_v58, %v664_v57  ;;  %v666_v62 = vpop.f32.mrb[47].mxu0  ;;  %v827_v63 = vpop.f32.mrb[47].mxu1 }
 0x1a8   : > { %947 = vst.msk [vmem:[#allocation2 + $0xb0] sm:$0xff] %vm162_vm0, %v915_v60  ;;  %v916_v0 = vadd.f32 %v884_v59, %v826_v61 }
 0x1aa   : > { %948 = vst.msk [vmem:[#allocation2 + $0xb8] sm:$0xff] %vm162_vm0, %v916_v0 }
 0x1ab   : > { %v669_v1 = vpop.f32.mrb[48].mxu0  ;;  %v830_v34 = vpop.f32.mrb[48].mxu1 }
 0x1ac   : > { %v831_v37 = vadd.f32 %v830_v34, %v669_v1  ;;  %v671_v38 = vpop.f32.mrb[49].mxu0  ;;  %v832_v39 = vpop.f32.mrb[49].mxu1 }
 0x1ad   : > { %v672_v36 = vpop.f32.mrb[50].mxu0  ;;  %v833_v40 = vpop.f32.mrb[50].mxu1 }
 0x1ae   : > { %v917_v42 = vadd.f32 %v885_v35, %v831_v37  ;;  %v834_v43 = vadd.f32 %v833_v40, %v672_v36  ;;  %v674_v44 = vpop.f32.mrb[51].mxu0  ;;  %v835_v46 = vpop.f32.mrb[51].mxu1 }
 0x1b0   : > { %949 = vst.msk [vmem:[#allocation2 + $0xc0] sm:$0xff] %vm162_vm0, %v917_v42  ;;  %v918_v47 = vadd.f32 %v886_v41, %v834_v43 }
 0x1b2   : > { %950 = vst.msk [vmem:[#allocation2 + $0xc8] sm:$0xff] %vm162_vm0, %v918_v47 }
 0x1b3   : > { %v677_v49 = vpop.f32.mrb[52].mxu0  ;;  %v838_v50 = vpop.f32.mrb[52].mxu1 }
 0x1b4   : > { %v839_v52 = vadd.f32 %v838_v50, %v677_v49  ;;  %v679_v53 = vpop.f32.mrb[53].mxu0  ;;  %v840_v48 = vpop.f32.mrb[53].mxu1 }
 0x1b5   : > { %v680_v54 = vpop.f32.mrb[54].mxu0  ;;  %v841_v45 = vpop.f32.mrb[54].mxu1 }
 0x1b6   : > { %v919_v56 = vadd.f32 %v887_v51, %v839_v52  ;;  %v842_v2 = vadd.f32 %v841_v45, %v680_v54  ;;  %v682_v3 = vpop.f32.mrb[55].mxu0  ;;  %v843_v4 = vpop.f32.mrb[55].mxu1 }
 0x1b8   : > { %951 = vst.msk [vmem:[#allocation2 + $0xd0] sm:$0xff] %vm162_vm0, %v919_v56  ;;  %v920_v5 = vadd.f32 %v888_v55, %v842_v2 }
 0x1ba   : > { %952 = vst.msk [vmem:[#allocation2 + $0xd8] sm:$0xff] %vm162_vm0, %v920_v5 }
 0x1bb   : > { %v685_v6 = vpop.f32.mrb[56].mxu0  ;;  %v846_v7 = vpop.f32.mrb[56].mxu1 }
 0x1bc   : > { %v847_v9 = vadd.f32 %v846_v7, %v685_v6  ;;  %v687_v10 = vpop.f32.mrb[57].mxu0  ;;  %v848_v11 = vpop.f32.mrb[57].mxu1 }
 0x1bd   : > { %v688_v12 = vpop.f32.mrb[58].mxu0  ;;  %v849_v13 = vpop.f32.mrb[58].mxu1 }
 0x1be   : > { %v921_v15 = vadd.f32 %v889_v8, %v847_v9  ;;  %v850_v16 = vadd.f32 %v849_v13, %v688_v12  ;;  %v690_v17 = vpop.f32.mrb[59].mxu0  ;;  %v851_v18 = vpop.f32.mrb[59].mxu1 }
 0x1c0   : > { %953 = vst.msk [vmem:[#allocation2 + $0xe0] sm:$0xff] %vm162_vm0, %v921_v15  ;;  %v922_v19 = vadd.f32 %v890_v14, %v850_v16 }
 0x1c2   : > { %954 = vst.msk [vmem:[#allocation2 + $0xe8] sm:$0xff] %vm162_vm0, %v922_v19 }
 0x1c3   : > { %v693_v20 = vpop.f32.mrb[60].mxu0  ;;  %v854_v21 = vpop.f32.mrb[60].mxu1 }
 0x1c4   : > { %v855_v23 = vadd.f32 %v854_v21, %v693_v20  ;;  %v695_v24 = vpop.f32.mrb[61].mxu0  ;;  %v856_v25 = vpop.f32.mrb[61].mxu1 }
 0x1c5   : > { %v696_v26 = vpop.f32.mrb[62].mxu0  ;;  %v857_v27 = vpop.f32.mrb[62].mxu1 }
 0x1c6   : > { %v923_v29 = vadd.f32 %v891_v22, %v855_v23  ;;  %v858_v30 = vadd.f32 %v857_v27, %v696_v26  ;;  %v698_v31 = vpop.f32.mrb[63].mxu0  ;;  %v859_v32 = vpop.f32.mrb[63].mxu1 }
 0x1c8   : > { %955 = vst.msk [vmem:[#allocation2 + $0xf0] sm:$0xff] %vm162_vm0, %v923_v29  ;;  %v924_v33 = vadd.f32 %v892_v28, %v858_v30 }
 0x1ca   : > { %956 = vst.msk [vmem:[#allocation2 + $0xf8] sm:$0xff] %vm162_vm0, %v924_v33 }
 0x1cb PF: > { %v2598_v57 = vld [vmem:[#allocation2 + $0x10] sm:$0xff]  ;;  %v2600_v58 = vld [vmem:[#allocation2] sm:$0xff]  ;;  %v2602_v59 = vld [vmem:[#allocation2 + $0x18] sm:$0xff]  ;;  %v2033_v60 = vmov 4   ;;  %vm1277_vm1 = vcmask 31744   ;;  %vm1310_vm2 = vcmask 39936  }
 0x1cc   : > { %1822 = vset.pattern.permute.xlu1 %v2033_v60  ;;  %1821 = vset.pattern.permute.xlu0 %v2033_v60  ;;  %v991_v61 = vmax.f32 %v2598_v57, 1.0  ;;  %v989_v62 = vmax.f32 %v2600_v58, 1.0  ;;  %v992_v63 = vmax.f32 %v2602_v59, 1.0  ;;  %v2607_v0 = vld [vmem:[#allocation2 + $0x8] sm:$0xff]  ;;  %v2612_v35 = vld [vmem:[#allocation2 + $0x20] sm:$0xff]  ;;  %v2616_v39 = vld [vmem:[#allocation2 + $0x38] sm:$0xff] }
 0x1cd   : > { %v990_v1 = vmax.f32 %v2607_v0, 1.0  ;;  %v2610_v34 = vld [vmem:[#allocation2 + $0x28] sm:$0xff]  ;;  %v993_v38 = vmax.f32 %v2612_v35, 1.0  ;;  %v2618_v36 = vld [vmem:[#allocation2 + $0x30] sm:$0xff]  ;;  %v996_v40 = vmax.f32 %v2616_v39, 1.0  ;;  %v2624_v43 = vld [vmem:[#allocation2 + $0x40] sm:$0xff] }
 0x1ce   : > { %1823 = vrcp.f32 %v991_v61  ;;  %v994_v37 = vmax.f32 %v2610_v34, 1.0  ;;  %v995_v41 = vmax.f32 %v2618_v36, 1.0  ;;  %v2622_v42 = vld [vmem:[#allocation2 + $0x48] sm:$0xff]  ;;  %v997_v49 = vmax.f32 %v2624_v43, 1.0  ;;  %v2628_v50 = vld [vmem:[#allocation2 + $0x58] sm:$0xff]  ;;  %v2630_v52 = vld [vmem:[#allocation2 + $0x50] sm:$0xff] }
 0x1cf   : > { %1825 = vrcp.f32 %v989_v62  ;;  %v998_v46 = vmax.f32 %v2622_v42, 1.0  ;;  %v1000_v48 = vmax.f32 %v2628_v50, 1.0  ;;  %v999_v54 = vmax.f32 %v2630_v52, 1.0  ;;  %v2634_v45 = vld [vmem:[#allocation2 + $0x68] sm:$0xff]  ;;  %v2636_v56 = vld [vmem:[#allocation2 + $0x60] sm:$0xff]  ;;  %v2640_v5 = vld [vmem:[#allocation2 + $0x78] sm:$0xff] }
 0x1d0   : > { %1827 = vrcp.f32 %v992_v63  ;;  %v1002_v3 = vmax.f32 %v2634_v45, 1.0  ;;  %v1001_v4 = vmax.f32 %v2636_v56, 1.0  ;;  %v2642_v7 = vld [vmem:[#allocation2 + $0x70] sm:$0xff]  ;;  %v1004_v9 = vmax.f32 %v2640_v5, 1.0  ;;  %v2646_v11 = vld [vmem:[#allocation2 + $0x88] sm:$0xff]  ;;  %v2648_v13 = vld [vmem:[#allocation2 + $0x80] sm:$0xff] }
 0x1d1   : > { %1829 = vrcp.f32 %v990_v1  ;;  %v1003_v10 = vmax.f32 %v2642_v7, 1.0  ;;  %v1006_v15 = vmax.f32 %v2646_v11, 1.0  ;;  %v1005_v16 = vmax.f32 %v2648_v13, 1.0  ;;  %v2652_v17 = vld [vmem:[#allocation2 + $0x98] sm:$0xff]  ;;  %v2654_v19 = vld [vmem:[#allocation2 + $0x90] sm:$0xff]  ;;  %v2658_v23 = vld [vmem:[#allocation2 + $0xa8] sm:$0xff] }
 0x1d2   : > { %1831 = vrcp.f32 %v994_v37  ;;  %v1008_v21 = vmax.f32 %v2652_v17, 1.0  ;;  %v1007_v22 = vmax.f32 %v2654_v19, 1.0  ;;  %v2660_v25 = vld [vmem:[#allocation2 + $0xa0] sm:$0xff]  ;;  %v1010_v27 = vmax.f32 %v2658_v23, 1.0  ;;  %v2664_v29 = vld [vmem:[#allocation2 + $0xb8] sm:$0xff]  ;;  %v2666_v31 = vld [vmem:[#allocation2 + $0xb0] sm:$0xff] }
 0x1d3   : > { %1833 = vrcp.f32 %v993_v38  ;;  %v1009_v28 = vmax.f32 %v2660_v25, 1.0  ;;  %v1012_v33 = vmax.f32 %v2664_v29, 1.0  ;;  %v1011_v60 = vmax.f32 %v2666_v31, 1.0  ;;  %v2670_v61 = vld [vmem:[#allocation2 + $0xc8] sm:$0xff]  ;;  %v2672_v63 = vld [vmem:[#allocation2 + $0xc0] sm:$0xff]  ;;  %s1748_s18 = sshll.u32 %s2017_s23, 8 }
 0x1d4   : > { %1835 = vrcp.f32 %v996_v40  ;;  %v1014_v37 = vmax.f32 %v2670_v61, 1.0  ;;  %v1013_v38 = vmax.f32 %v2672_v63, 1.0  ;;  %v2676_v40 = vld [vmem:[#allocation2 + $0xd8] sm:$0xff]  ;;  %s1458_s19 = sshll.u32 %s2320_s5, 4  ;;  %s2898_s26 = scalar_lea.hbm %s2950_s3, %s1748_s18  ;;  %s2900_s19 = int_to_ptr.vmem [resolvable:$true] %s1458_s19 }
 0x1d5   : > { %1837 = vrcp.f32 %v995_v41  ;;  %s1442_s27 = scalar_lea.sflag [#allocation8], %s2172_s11  ;;  %s1941_s29 = scalar_lea.vmem %s2900_s19, 256 }
 0x1d6   : > { %1839 = vrcp.f32 %v998_v46  ;;  %p1942_p10 = scmp.ne.s32.totalorder %s2900_s19, %s1941_s29  ;;  %p2972_p3 = scmp.ne.s32.totalorder %s2955_s6, 0 }
 0x1d7   : > { %1841 = vrcp.f32 %v997_v49  ;;  %s2034_s23 = smov [#allocation9]  }
 0x1d8   : > { %v1824_v44 = vpop.eup %1823  ;;  %1843 = vrcp.f32 %v1000_v48  ;;  %v2684_v48 = vld [vmem:[#allocation2 + $0xe0] sm:$0xff]  ;;  %p1943_p9 = pnand %p1942_p10, %p2972_p3  ;;  %s1945_s30 = sshll.u32 %s2034_s23, 4  ;;  %s1946_s30 = int_to_ptr.vmem [resolvable:$false] %s1945_s30 }
 0x1d9   : > { %v1826_v47 = vpop.eup %1825  ;;  %1097 = vperm.xlu1 %1822, %v1824_v44   ;;  %1845 = vrcp.f32 %v999_v54  ;;  %v2678_v44 = vld [vmem:[#allocation2 + $0xd0] sm:$0xff]  ;;  %s1947_s4 = scalar_lea.vmem %s1946_s30, 512  ;;  %p1948_p2 = scmp.lt.s32.totalorder %s2900_s19, %s1946_s30 }
 0x1da   : > { %v1828_v51 = vpop.eup %1827  ;;  %1087 = vperm.xlu0 %1821, %v1826_v47   ;;  %1847 = vrcp.f32 %v1002_v3  ;;  %v1016_v47 = vmax.f32 %v2676_v40, 1.0  ;;  %v1015_v49 = vmax.f32 %v2678_v44, 1.0  ;;  %v2688_v3 = vld [vmem:[#allocation2 + $0xf8] sm:$0xff]  ;;  %p1944_p13 = pneg %p1943_p9  ;;  %p1949_p0 = scmp.lt.s32.totalorder %s1947_s4, %s1941_s29 }
 0x1db   : > { %v1830_v53 = vpop.eup %1829  ;;  %1849 = vrcp.f32 %v1001_v4 }
 0x1dc   : > { %v1832_v55 = vpop.eup %1831  ;;  %1851 = vrcp.f32 %v1004_v9  ;;  %v1020_v9 = vmax.f32 %v2688_v3, 1.0  ;;  %p1950_p6 = por %p1949_p0, %p1948_p2 }
 0x1dd   : > { %1102 = vperm.xlu1 %1822, %v1828_v51   ;;  %v1834_v2 = vpop.eup %1833  ;;  %1853 = vrcp.f32 %v1003_v10  ;;  %v2682_v51 = vld [vmem:[#allocation2 + $0xe8] sm:$0xff] }
 0x1de   : > { %1092 = vperm.xlu0 %1821, %v1830_v53   ;;  %v1836_v6 = vpop.eup %1835  ;;  %1855 = vrcp.f32 %v1006_v15  ;;  %p1951_p8 = pnand %p1950_p6, %p1944_p13 }
 0x1df   : > { %v1838_v8 = vpop.eup %1837  ;;  %1857 = vrcp.f32 %v1005_v16 }
 0x1e0   : > { %v1840_v12 = vpop.eup %1839  ;;  %1859 = vrcp.f32 %v1008_v21 }
 0x1e1   : > { %1112 = vperm.xlu1 %1822, %v1832_v55   ;;  %v1842_v14 = vpop.eup %1841  ;;  %1861 = vrcp.f32 %v1007_v22  ;;  %v1018_v55 = vmax.f32 %v2682_v51, 1.0 }
 0x1e2   : > { %1107 = vperm.xlu0 %1821, %v1834_v2   ;;  %v1844_v18 = vpop.eup %1843  ;;  %1863 = vrcp.f32 %v1010_v27  ;;  %v1017_v2 = vmax.f32 %v2684_v48, 1.0 }
 0x1e3   : > { %v1846_v20 = vpop.eup %1845  ;;  %1865 = vrcp.f32 %v1009_v28 }
 0x1e4   : > { %v1848_v24 = vpop.eup %1847  ;;  %1867 = vrcp.f32 %v1012_v33 }
 0x1e5   : > { %1122 = vperm.xlu1 %1822, %v1836_v6   ;;  %v1850_v26 = vpop.eup %1849  ;;  %1869 = vrcp.f32 %v1011_v60  ;;  %v2690_v6 = vld [vmem:[#allocation2 + $0xf0] sm:$0xff] }
 0x1e6   : > { %1117 = vperm.xlu0 %1821, %v1838_v8   ;;  %v1852_v30 = vpop.eup %1851  ;;  %1871 = vrcp.f32 %v1014_v37  ;;  %v1019_v10 = vmax.f32 %v2690_v6, 1.0 }
 0x1e7   : > { %v1854_v32 = vpop.eup %1853  ;;  %1873 = vrcp.f32 %v1013_v38 }
 0x1e8   : > { %v1856_v62 = vpop.eup %1855  ;;  %1875 = vrcp.f32 %v1016_v47 }
 0x1e9   : > { %1132 = vperm.xlu1 %1822, %v1840_v12   ;;  %v1858_v1 = vpop.eup %1857  ;;  %1877 = vrcp.f32 %v1015_v49 }
 0x1ea   : > { %1127 = vperm.xlu0 %1821, %v1842_v14   ;;  %v1860_v41 = vpop.eup %1859  ;;  %1879 = vrcp.f32 %v1018_v55 }
 0x1eb   : > { %v1862_v46 = vpop.eup %1861  ;;  %1881 = vrcp.f32 %v1017_v2 }
 0x1ec   : > { %v1864_v53 = vpop.eup %1863  ;;  %1883 = vrcp.f32 %v1020_v9 }
 0x1ed   : > { %1142 = vperm.xlu1 %1822, %v1844_v18   ;;  %v1866_v54 = vpop.eup %1865  ;;  %1885 = vrcp.f32 %v1019_v10 }
 0x1ee   : > { %1137 = vperm.xlu0 %1821, %v1846_v20   ;;  %v1868_v4 = vpop.eup %1867 }
 0x1ef   : > { %v1870_v8 = vpop.eup %1869 }
 0x1f0   : > { %v1872_v12 = vpop.eup %1871 }
 0x1f1   : > { %1152 = vperm.xlu1 %1822, %v1848_v24   ;;  %v1874_v14 = vpop.eup %1873 }
 0x1f2   : > { %1147 = vperm.xlu0 %1821, %v1850_v26   ;;  %v1876_v15 = vpop.eup %1875 }
 0x1f3   : > { %v1878_v16 = vpop.eup %1877 }
 0x1f4   : > { %v1880_v18 = vpop.eup %1879 }
 0x1f5   : > { %1162 = vperm.xlu1 %1822, %v1852_v30   ;;  %v1882_v20 = vpop.eup %1881 }
 0x1f6   : > { %1157 = vperm.xlu0 %1821, %v1854_v32   ;;  %v1884_v21 = vpop.eup %1883 }
 0x1f7   : > { %v1886_v22 = vpop.eup %1885 }
 0x1f9   : > { %1172 = vperm.xlu1 %1822, %v1856_v62  }
 0x1fa   : > { %1167 = vperm.xlu0 %1821, %v1858_v1  }
 0x1fd   : > { %1182 = vperm.xlu1 %1822, %v1860_v41  }
 0x1fe   : > { %1177 = vperm.xlu0 %1821, %v1862_v46  }
 0x201   : > { %1192 = vperm.xlu1 %1822, %v1864_v53  }
 0x202   : > { %1187 = vperm.xlu0 %1821, %v1866_v54  }
 0x205   : > { %1202 = vperm.xlu1 %1822, %v1868_v4  }
 0x206   : > { %1197 = vperm.xlu0 %1821, %v1870_v8  }
 0x209   : > { %1212 = vperm.xlu1 %1822, %v1872_v12  }
 0x20a   : > { %1207 = vperm.xlu0 %1821, %v1874_v14  }
 0x20d   : > { %1222 = vperm.xlu1 %1822, %v1876_v15  }
 0x20e   : > { %1217 = vperm.xlu0 %1821, %v1878_v16  }
 0x211   : > { %1232 = vperm.xlu1 %1822, %v1880_v18  }
 0x212   : > { %1227 = vperm.xlu0 %1821, %v1882_v20  }
 0x215   : > { %1242 = vperm.xlu1 %1822, %v1884_v21  }
 0x216   : > { %1237 = vperm.xlu0 %1821, %v1886_v22  }
 0x258   : > { %v1098_v24 = vpop.permute.xlu1 %1097 }
 0x259   : > { %v1088_v26 = vpop.permute.xlu0 %1087  ;;  %v1247_v28 = vmul.f32 %v1098_v24, %v2598_v57 }
 0x25a   : > { %v1245_v27 = vmul.f32 %v1088_v26, %v2600_v58 }
 0x25b   : > { %v1280_v37 = vsel %vm1277_vm1, %v1247_v28, %v2598_v57 }
 0x25c   : > { %v1103_v30 = vpop.permute.xlu1 %1102  ;;  %v1278_v32 = vsel %vm1277_vm1, %v1245_v27, %v2600_v58  ;;  %v1313_v53 = vsel %vm1310_vm2, %v1280_v37, %v2598_v57 }
 0x25d   : > { %v1093_v33 = vpop.permute.xlu0 %1092  ;;  %v1311_v60 = vsel %vm1310_vm2, %v1278_v32, %v2600_v58  ;;  %v1248_v38 = vmul.f32 %v1103_v30, %v2602_v59  ;;  %v1345_v8 = vsel %vm162_vm0, %v1313_v53, 0.0 }
 0x25e   : > { %v1246_v62 = vmul.f32 %v1093_v33, %v2607_v0  ;;  %v1343_v1 = vsel %vm162_vm0, %v1311_v60, 0.0 }
 0x25f   : > { %1375 = vxpose.xlu0.b32.start [1/16] (narrow) %v1343_v1, 8  ;;  %v1281_v54 = vsel %vm1277_vm1, %v1248_v38, %v2602_v59 }
 0x260   : > { %v1279_v41 = vsel %vm1277_vm1, %v1246_v62, %v2607_v0  ;;  %v1113_v46 = vpop.permute.xlu1 %1112  ;;  %v1314_v9 = vsel %vm1310_vm2, %v1281_v54, %v2602_v59 }
 0x261   : > { %v1108_v47 = vpop.permute.xlu0 %1107  ;;  %v1312_v49 = vsel %vm1310_vm2, %v1279_v41, %v2607_v0  ;;  %v1250_v0 = vmul.f32 %v1113_v46, %v2610_v34  ;;  %v1346_v14 = vsel %vm162_vm0, %v1314_v9, 0.0 }
 0x262   : > { %v1344_v58 = vsel %vm162_vm0, %v1312_v49, 0.0  ;;  %v1249_v55 = vmul.f32 %v1108_v47, %v2612_v35 }
 0x263   : > { %1376 = vxpose.xlu0.b32.cont [2/16] (narrow) %v1344_v58, 8  ;;  %v1283_v16 = vsel %vm1277_vm1, %v1250_v0, %v2610_v34 }
 0x264   : > { %v1123_v2 = vpop.permute.xlu1 %1122  ;;  %v1282_v10 = vsel %vm1277_vm1, %v1249_v55, %v2612_v35  ;;  %v1316_v22 = vsel %vm1310_vm2, %v1283_v16, %v2610_v34 }
 0x265   : > { %v1118_v4 = vpop.permute.xlu0 %1117  ;;  %v1315_v15 = vsel %vm1310_vm2, %v1282_v10, %v2612_v35  ;;  %v1252_v24 = vmul.f32 %v1123_v2, %v2616_v39  ;;  %v1348_v28 = vsel %vm162_vm0, %v1316_v22, 0.0 }
 0x266   : > { %v1251_v18 = vmul.f32 %v1118_v4, %v2618_v36  ;;  %v1347_v21 = vsel %vm162_vm0, %v1315_v15, 0.0 }
 0x267   : > { %1377 = vxpose.xlu0.b32.cont [3/16] (narrow) %v1345_v8, 8  ;;  %v1285_v32 = vsel %vm1277_vm1, %v1252_v24, %v2616_v39 }
 0x268   : > { %v1133_v12 = vpop.permute.xlu1 %1132  ;;  %v1284_v26 = vsel %vm1277_vm1, %v1251_v18, %v2618_v36  ;;  %v1318_v1 = vsel %vm1310_vm2, %v1285_v32, %v2616_v39 }
 0x269   : > { %v1128_v57 = vpop.permute.xlu0 %1127  ;;  %v1317_v30 = vsel %vm1310_vm2, %v1284_v26, %v2618_v36  ;;  %v1254_v37 = vmul.f32 %v1133_v12, %v2622_v42  ;;  %v1350_v49 = vsel %vm162_vm0, %v1318_v1, 0.0 }
 0x26a   : > { %v1253_v33 = vmul.f32 %v1128_v57, %v2624_v43  ;;  %v1349_v62 = vsel %vm162_vm0, %v1317_v30, 0.0 }
 0x26b   : > { %1378 = vxpose.xlu0.b32.cont [4/16] (narrow) %v1346_v14, 8  ;;  %v1287_v39 = vsel %vm1277_vm1, %v1254_v37, %v2622_v42 }
 0x26c   : > { %v1143_v20 = vpop.permute.xlu1 %1142  ;;  %v1286_v36 = vsel %vm1277_vm1, %v1253_v33, %v2624_v43  ;;  %v1320_v12 = vsel %vm1310_vm2, %v1287_v39, %v2622_v42 }
 0x26d   : > { %v1138_v59 = vpop.permute.xlu0 %1137  ;;  %v1319_v58 = vsel %vm1310_vm2, %v1286_v36, %v2624_v43  ;;  %v1256_v9 = vmul.f32 %v1143_v20, %v2628_v50 }
 0x26e   : > { %v1255_v53 = vmul.f32 %v1138_v59, %v2630_v52  ;;  %v1351_v0 = vsel %vm162_vm0, %v1319_v58, 0.0  ;;  %v1352_v59 = vsel %vm162_vm0, %v1320_v12, 0.0 }
 0x26f   : > { %1379 = vxpose.xlu0.b32.cont [5/16] (narrow) %v1347_v21, 8  ;;  %v1289_v20 = vsel %vm1277_vm1, %v1256_v9, %v2628_v50 }
 0x270   : > { %v1153_v27 = vpop.permute.xlu1 %1152  ;;  %v1288_v14 = vsel %vm1277_vm1, %v1255_v53, %v2630_v52 }
 0x271   : > { %v1148_v35 = vpop.permute.xlu0 %1147  ;;  %v1258_v32 = vmul.f32 %v1153_v27, %v2634_v45 }
 0x272   : > { %v1257_v21 = vmul.f32 %v1148_v35, %v2636_v56 }
 0x273   : > { %1380 = vxpose.xlu0.b32.cont [6/16] (narrow) %v1348_v28, 8 }
 0x274   : > { %v2739_v60 = vpop.permute.xlu1 %1162 }
 0x275   : > { %v2741_v34 = vpop.permute.xlu0 %1157  ;;  %v1260_v9 = vmul.f32 %v2739_v60, %v2640_v5 }
 0x277   : > { %1381 = vxpose.xlu0.b32.cont [7/16] (narrow) %v1349_v62, 8  ;;  %v1322_v62 = vsel %vm1310_vm2, %v1289_v20, %v2628_v50  ;;  %v1291_v50 = vsel %vm1277_vm1, %v1258_v32, %v2634_v45 }
 0x278   : > { %v1173_v38 = vpop.permute.xlu1 %1172 }
 0x279   : > { %v1262_v41 = vmul.f32 %v1173_v38, %v2646_v11  ;;  %v1168_v46 = vpop.permute.xlu0 %1167 }
 0x27a   : > { %v1261_v47 = vmul.f32 %v1168_v46, %v2648_v13 }
 0x27b   : > { %1382 = vxpose.xlu0.b32.cont [8/16] (narrow) %v1350_v49, 8  ;;  %v1295_v54 = vsel %vm1277_vm1, %v1262_v41, %v2646_v11  ;;  %v1354_v41 = vsel %vm162_vm0, %v1322_v62, 0.0  ;;  %v1259_v49 = vmul.f32 %v2741_v34, %v2642_v7 }
 0x27c   : > { %v1183_v55 = vpop.permute.xlu1 %1182  ;;  %v1294_v2 = vsel %vm1277_vm1, %v1261_v47, %v2648_v13  ;;  %v1328_v57 = vsel %vm1310_vm2, %v1295_v54, %v2646_v11  ;;  %v1321_v11 = vsel %vm1310_vm2, %v1288_v14, %v2630_v52  ;;  %v1290_v52 = vsel %vm1277_vm1, %v1257_v21, %v2636_v56 }
 0x27d   : > { %v1178_v4 = vpop.permute.xlu0 %1177  ;;  %v1327_v8 = vsel %vm1310_vm2, %v1294_v2, %v2648_v13  ;;  %v1264_v13 = vmul.f32 %v1183_v55, %v2652_v17  ;;  %v1360_v42 = vsel %vm162_vm0, %v1328_v57, 0.0  ;;  %v1353_v33 = vsel %vm162_vm0, %v1321_v11, 0.0 }
 0x27e   : > { %v1263_v43 = vmul.f32 %v1178_v4, %v2654_v19  ;;  %v1359_v10 = vsel %vm162_vm0, %v1327_v8, 0.0  ;;  %v1324_v8 = vsel %vm1310_vm2, %v1291_v50, %v2634_v45 }
 0x27f   : > { %1383 = vxpose.xlu0.b32.cont [9/16] (narrow) %v1351_v0, 8  ;;  %1407 = vxpose.xlu1.b32.start [1/16] (narrow) %v1359_v10, 8  ;;  %v1297_v24 = vsel %vm1277_vm1, %v1264_v13, %v2652_v17  ;;  %v1356_v20 = vsel %vm162_vm0, %v1324_v8, 0.0 }
 0x280   : > { %v1296_v15 = vsel %vm1277_vm1, %v1263_v43, %v2654_v19  ;;  %v1193_v16 = vpop.permute.xlu1 %1192 }
 0x281   : > { %v1188_v18 = vpop.permute.xlu0 %1187  ;;  %v1329_v22 = vsel %vm1310_vm2, %v1296_v15, %v2654_v19  ;;  %v1330_v19 = vsel %vm1310_vm2, %v1297_v24, %v2652_v17  ;;  %v1266_v1 = vmul.f32 %v1193_v16, %v2658_v23  ;;  %v1323_v17 = vsel %vm1310_vm2, %v1290_v52, %v2636_v56 }
 0x282   : > { %v1265_v26 = vmul.f32 %v1188_v18, %v2660_v25  ;;  %v1361_v35 = vsel %vm162_vm0, %v1329_v22, 0.0  ;;  %v1362_v47 = vsel %vm162_vm0, %v1330_v19, 0.0  ;;  %v1355_v0 = vsel %vm162_vm0, %v1323_v17, 0.0 }
 0x283   : > { %1384 = vxpose.xlu0.b32.cont [10/16] (narrow) %v1352_v59, 8  ;;  %1408 = vxpose.xlu1.b32.cont [2/16] (narrow) %v1360_v42, 8  ;;  %v1299_v53 = vsel %vm1277_vm1, %v1266_v1, %v2658_v23 }
 0x284   : > { %v1203_v28 = vpop.permute.xlu1 %1202  ;;  %v1298_v27 = vsel %vm1277_vm1, %v1265_v26, %v2660_v25  ;;  %v1332_v45 = vsel %vm1310_vm2, %v1299_v53, %v2658_v23 }
 0x285   : > { %v1198_v30 = vpop.permute.xlu0 %1197  ;;  %v1331_v39 = vsel %vm1310_vm2, %v1298_v27, %v2660_v25  ;;  %v1364_v59 = vsel %vm162_vm0, %v1332_v45, 0.0 }
 0x286   : > { %v1267_v54 = vmul.f32 %v1198_v30, %v2666_v31  ;;  %v1363_v10 = vsel %vm162_vm0, %v1331_v39, 0.0 }
 0x287   : > { %1385 = vxpose.xlu0.b32.cont [11/16] (narrow) %v1353_v33, 8  ;;  %1409 = vxpose.xlu1.b32.cont [3/16] (narrow) %v1361_v35, 8 }
 0x288   : > { %v1213_v37 = vpop.permute.xlu1 %1212  ;;  %v1300_v60 = vsel %vm1277_vm1, %v1267_v54, %v2666_v31 }
 0x289   : > { %v1270_v36 = vmul.f32 %v1213_v37, %v2670_v61  ;;  %v1208_v38 = vpop.permute.xlu0 %1207  ;;  %v1333_v21 = vsel %vm1310_vm2, %v1300_v60, %v2666_v31 }
 0x28a   : > { %v1269_v46 = vmul.f32 %v1208_v38, %v2672_v63  ;;  %v1365_v33 = vsel %vm162_vm0, %v1333_v21, 0.0 }
 0x28b   : > { %v1303_v58 = vsel %vm1277_vm1, %v1270_v36, %v2670_v61  ;;  %1386 = vxpose.xlu0.b32.cont [12/16] (narrow) %v1354_v41, 8  ;;  %1410 = vxpose.xlu1.b32.cont [4/16] (narrow) %v1362_v47, 8 }
 0x28c   : > { %v1302_v55 = vsel %vm1277_vm1, %v1269_v46, %v2672_v63  ;;  %v1223_v56 = vpop.permute.xlu1 %1222  ;;  %v1336_v34 = vsel %vm1310_vm2, %v1303_v58, %v2670_v61  ;;  %v1292_v61 = vsel %vm1277_vm1, %v1259_v49, %v2642_v7 }
 0x28d   : > { %v1272_v2 = vmul.f32 %v1223_v56, %v2676_v40  ;;  %v1218_v4 = vpop.permute.xlu0 %1217  ;;  %v1335_v25 = vsel %vm1310_vm2, %v1302_v55, %v2672_v63  ;;  %v1268_v63 = vmul.f32 %v1203_v28, %v2664_v29 }
 0x28e   : > { %v1271_v43 = vmul.f32 %v1218_v4, %v2678_v44 }
 0x28f   : > { %v1305_v12 = vsel %vm1277_vm1, %v1272_v2, %v2676_v40  ;;  %1387 = vxpose.xlu0.b32.cont [13/16] (narrow) %v1355_v0, 8  ;;  %1411 = vxpose.xlu1.b32.cont [5/16] (narrow) %v1363_v10, 8  ;;  %v1301_v11 = vsel %vm1277_vm1, %v1268_v63, %v2664_v29 }
 0x290   : > { %v1304_v57 = vsel %vm1277_vm1, %v1271_v43, %v2678_v44  ;;  %v1233_v14 = vpop.permute.xlu1 %1232  ;;  %v1338_v13 = vsel %vm1310_vm2, %v1305_v12, %v2676_v40  ;;  %v1325_v40 = vsel %vm1310_vm2, %v1292_v61, %v2642_v7  ;;  %v1334_v62 = vsel %vm1310_vm2, %v1301_v11, %v2664_v29 }
 0x291   : > { %v1274_v15 = vmul.f32 %v1233_v14, %v2682_v51  ;;  %v1228_v16 = vpop.permute.xlu0 %1227  ;;  %v1337_v18 = vsel %vm1310_vm2, %v1304_v57, %v2678_v44  ;;  %v1293_v44 = vsel %vm1277_vm1, %v1260_v9, %v2640_v5  ;;  %v1357_v32 = vsel %vm162_vm0, %v1325_v40, 0.0 }
 0x292   : > { %v1273_v23 = vmul.f32 %v1228_v16, %v2684_v48  ;;  %v1366_v27 = vsel %vm162_vm0, %v1334_v62, 0.0  ;;  %v1368_v29 = vsel %vm162_vm0, %v1336_v34, 0.0 }
 0x293   : > { %v1307_v42 = vsel %vm1277_vm1, %v1274_v15, %v2682_v51  ;;  %1388 = vxpose.xlu0.b32.cont [14/16] (narrow) %v1356_v20, 8  ;;  %1412 = vxpose.xlu1.b32.cont [6/16] (narrow) %v1364_v59, 8 }
 0x294   : > { %v1306_v22 = vsel %vm1277_vm1, %v1273_v23, %v2684_v48  ;;  %v1243_v24 = vpop.permute.xlu1 %1242  ;;  %v1340_v26 = vsel %vm1310_vm2, %v1307_v42, %v2682_v51  ;;  %v1326_v51 = vsel %vm1310_vm2, %v1293_v44, %v2640_v5  ;;  %v1367_v5 = vsel %vm162_vm0, %v1335_v25, 0.0 }
 0x295   : > { %v1276_v28 = vmul.f32 %v1243_v24, %v2688_v3  ;;  %v1238_v30 = vpop.permute.xlu0 %1237  ;;  %v1339_v7 = vsel %vm1310_vm2, %v1306_v22, %v2684_v48  ;;  %v1358_v1 = vsel %vm162_vm0, %v1326_v51, 0.0  ;;  %v1372_v36 = vsel %vm162_vm0, %v1340_v26, 0.0 }
 0x296   : > { %v1275_v31 = vmul.f32 %v1238_v30, %v2690_v6  ;;  %v1371_v37 = vsel %vm162_vm0, %v1339_v7, 0.0 }
 0x297   : > { %v1309_v35 = vsel %vm1277_vm1, %v1276_v28, %v2688_v3  ;;  %1389 = vxpose.xlu0.b32.cont [15/16] (narrow) %v1357_v32, 8  ;;  %1413 = vxpose.xlu1.b32.cont [7/16] (narrow) %v1365_v33, 8 }
 0x298   : > { %v1308_v48 = vsel %vm1277_vm1, %v1275_v31, %v2690_v6  ;;  %v1342_v52 = vsel %vm1310_vm2, %v1309_v35, %v2688_v3  ;;  %v1369_v3 = vsel %vm162_vm0, %v1337_v18, 0.0 }
 0x299   : > { %v1341_v19 = vsel %vm1310_vm2, %v1308_v48, %v2690_v6  ;;  %v1370_v6 = vsel %vm162_vm0, %v1338_v13, 0.0  ;;  %v1374_v41 = vsel %vm162_vm0, %v1342_v52, 0.0 }
 0x29a   : > { %v1373_v38 = vsel %vm162_vm0, %v1341_v19, 0.0 }
 0x29b   : > { %1390 = vxpose.xlu0.b32.end [16/16] (narrow) %v1358_v1, 8  ;;  %1414 = vxpose.xlu1.b32.cont [8/16] (narrow) %v1366_v27, 8 }
 0x29f   : > { %1415 = vxpose.xlu1.b32.cont [9/16] (narrow) %v1367_v5, 8 }
 0x2a3   : > { %1416 = vxpose.xlu1.b32.cont [10/16] (narrow) %v1368_v29, 8 }
 0x2a7   : > { %1417 = vxpose.xlu1.b32.cont [11/16] (narrow) %v1369_v3, 8 }
 0x2ab   : > { %1418 = vxpose.xlu1.b32.cont [12/16] (narrow) %v1370_v6, 8 }
 0x2af   : > { %1419 = vxpose.xlu1.b32.cont [13/16] (narrow) %v1371_v37, 8 }
 0x2b3   : > { %1420 = vxpose.xlu1.b32.cont [14/16] (narrow) %v1372_v36, 8 }
 0x2b7   : > { %1421 = vxpose.xlu1.b32.cont [15/16] (narrow) %v1373_v38, 8 }
 0x2bb   : > { %1422 = vxpose.xlu1.b32.end [16/16] (narrow) %v1374_v41, 8 }
 0x2df   : > { %v1391_v50 = vpop.trf.xlu0 }
 0x2e0   : > { %1439 = vst [vmem:[%s2320_s5] sm:$0xff] %v1391_v50 }
 0x2ff   : > { %v1423_v46 = vpop.trf.xlu1 }
 0x300   : > { %1440 = vst [vmem:[%s2320_s5 + $0x8] sm:$0xff] %v1423_v46 }
 0x301   : > { %1954 = shalt.err (!%p1951_p8)
}
 0x302   : > { %s1955_s9 = scalar_lea.hbm %s2898_s26, 256  ;;  %s1959_s12 = scalar_lea.hbm %s2950_s3, 512 }
 0x303   : > { %p1956_p11 = scmp.ne.s32.totalorder %s2898_s26, %s1955_s9  ;;  %p1960_p4 = scmp.lt.u32.totalorder %s2898_s26, %s2950_s3 }
 0x304   : > { %p1961_p5 = scmp.lt.u32.totalorder %s1959_s12, %s1955_s9  ;;  %p1963_p10 = scmp.lt.u32.totalorder %s1955_s9, %s2898_s26 }
 0x305   : > { %p1957_p12 = pnand %p1956_p11, %p2972_p3 }
 0x306   : > { %p1962_p7 = por %p1961_p5, %p1960_p4 }
 0x307   : > { %p1958_p1 = pneg %p1957_p12 }
 0x308   : > { %p1964_p9 = por %p1963_p10, %p1962_p7 }
 0x30a   : > { %p1965_p13 = pnand %p1964_p9, %p1958_p1 }
 0x30c   : > { %1968 = shalt.err (!%p1965_p13)
}
 0x30d   : > { %1755 = dma.vmem_to_hbm [thread:$0]  (%p2972_p3), %s2900_s19, 256, %s2898_s26, %s1442_s27  }
 0x30e PF: > { %s1470_s14 = sand.u32 1, %s2005_s1   ;;  %p2973_p2 = scmp.ne.s32.totalorder %s2956_s8, 0 }
 0x30f   : > { %p2974_p0 = scmp.ge.s32.totalorder %s2025_s25, 2  ;;  %s1471_s16 = scalar_lea.sflag [#allocation8], %s1470_s14 }
 0x311   : > { %p1762_p6 = pnand %p2974_p0, %p2973_p2 }
 0x313   : > { %2000 = dma.done.wait (!%p1762_p6), %s1471_s16, 256  }
 0x314   : > { %2002 = vsyncadd (!%p1762_p6), %s1471_s16, 4294967040  ;;  %s29_s25 = sadd.s32 1, %s2025_s25   ;;  %s2975_s1 = smov %s2009_s21 }
 0x315   : > { %p26_p8 = scmp.ge.s32.totalorder %s29_s25, 4   ;;  %s2976_s21 = smov %s2013_s22 }
 0x316   : > { %s2977_s22 = smov %s2117_s7  ;;  %s2978_s23 = smov %s2021_s24 }
 0x317   : > { %s2979_s24 = smov %s2981_s28  ;;  %28 = sbr.rel (!%p26_p8) target bundleno = 31 (0x1f), region = 73 }
 0x31e   :  { %1476 = vsyncpa [#allocation7], 1 }
 0x31f   :  { %1478 = vsyncpa [#allocation7 + $0x1], 1 }
 0x320   :  { %1479 = vsyncpa [#allocation8], 1 }
 0x321   :  { %1481 = vsyncpa [#allocation8 + $0x1], 1 }

</bundles_post_ra>
